<compile_context>
chip_gen: v6e
topology: v6e:2x2x1
jax: 0.10.0
libtpu: 0.0.40
codegen_flags: <defaults>
</compile_context>

<pallas_src>
import jax
import jax.numpy as jnp
from jax.experimental import pallas as pl
from jax.experimental.pallas import tpu as pltpu


def _round_up(x, m):
    return ((x + m - 1) // m) * m


def _descriptor_kernel(x_ref, halo_ref, w1_ref, scale_ref, bias_ref, w2_ref,
                       b2_ref, out_ref):
    # x_ref    : (TH, Wp, Cin)    bf16  main rows of the padded input strip
    # halo_ref : (2,  Wp, Cin)    bf16  two rows just below the strip
    # w1_ref   : (3, 3*Cin, Cout) bf16  3x3 weights grouped by width tap dj,
    #                                   K iterates (di, cin)
    # scale_ref, bias_ref : (1, Cout) f32  folded conv1-bias + eval-mode BN
    # w2_ref   : (Cout, Cout)     bf16  1x1 conv weights
    # b2_ref   : (1, Cout)        f32
    # out_ref  : (TH, Wo, Cout)
    TH, Wo, Cout = out_ref.shape
    Cin = x_ref.shape[-1]

    # Full (TH+2)-row strip: main rows + 2-row bottom halo.
    xs = jnp.concatenate([x_ref[...], halo_ref[...]], axis=0)  # (TH+2, Wp, Cin)

    # 3x3 conv as 3 accumulating MXU matmuls (one per width tap dj), K=3*Cin.
    acc = jnp.zeros((TH * Wo, Cout), jnp.float32)
    for dj in range(3):
        slab = xs[:, dj:dj + Wo, :]                             # (TH+2, Wo, Cin)
        patch = jnp.concatenate(
            [slab[0:TH], slab[1:TH + 1], slab[2:TH + 2]], axis=-1
        ).reshape(TH * Wo, 3 * Cin)                             # bf16
        acc = acc + jnp.dot(patch, w1_ref[dj],
                            preferred_element_type=jnp.float32)

    # Folded BatchNorm (eval mode) + ReLU, f32 epilogue on the VPU.
    h = jnp.maximum(acc * scale_ref[...] + bias_ref[...], 0.0)

    # 1x1 conv == per-pixel channel matmul (bf16 operands, f32 accumulate).
    out = jnp.dot(h.astype(jnp.bfloat16), w2_ref[...],
                  preferred_element_type=jnp.float32) + b2_ref[...]
    out_ref[...] = out.reshape(TH, Wo, Cout).astype(out_ref.dtype)


def descriptor_forward(x_nhwc, params, *, th=None, out_dtype=jnp.bfloat16):
    """x_nhwc: (B, H, W, Cin) float32.  Returns (B, H, W, Cout) out_dtype."""
    w1, b1 = params["w1"], params["b1"]
    bn_gamma, bn_beta = params["bn_gamma"], params["bn_beta"]
    bn_mean, bn_var = params["bn_mean"], params["bn_var"]
    w2, b2 = params["w2"], params["b2"]

    B, H, W, Cin = x_nhwc.shape
    Cout = w1.shape[-1]
    eps = 1e-5

    # Fold conv1 bias + eval-mode BatchNorm into per-channel scale / bias.
    scale = bn_gamma / jnp.sqrt(bn_var + eps)                   # (Cout,)
    bias = bn_beta + scale * (b1 - bn_mean)                     # (Cout,)
    scale2d = scale.reshape(1, Cout).astype(jnp.float32)
    bias2d = bias.reshape(1, Cout).astype(jnp.float32)
    b2_2d = b2.reshape(1, Cout).astype(jnp.float32)

    # Weights cast once to bf16.  w1 is (3,3,Cin,Cout) HWIO -> grouped by the
    # width tap dj: w1g[dj] = w1[:, dj].reshape(3*Cin, Cout), K = (di, cin).
    w1g = jnp.transpose(w1, (1, 0, 2, 3)).reshape(3, 3 * Cin, Cout)
    w1g = w1g.astype(jnp.bfloat16)
    w2b = w2.astype(jnp.bfloat16)

    # Spatial tiling: compute width Wo (multiple of 8), padded width Wp (room
    # for the +-1 column halo), strip height TH so TH*Wo ~ 1024 pixels.
    Wo = _round_up(W, 8)
    Wp = Wo + 8
    if th is None:
        th = min(128, max(8, _round_up(-(-1024 // Wo), 8)))
    TH = min(th, _round_up(H, 8))
    Hp = _round_up(H, TH)
    n_strips = Hp // TH

    # One bf16 padded copy of the input: 1 zero row on top, (1 + Hp - H) rows
    # at the bottom, 1 zero column left, Wp - W - 1 zero columns right.
    x_bf = x_nhwc.astype(jnp.bfloat16)
    xp = jnp.pad(x_bf, ((0, 0), (1, 1 + Hp - H), (1, Wp - W - 1), (0, 0)))
    # xp: (B, Hp + 2, Wp, Cin)

    # Bottom-halo rows per strip: rows [s*TH + TH, s*TH + TH + 2) of xp.
    row_idx = TH + TH * jnp.arange(n_strips)[:, None] + jnp.arange(2)[None, :]
    halos = xp[:, row_idx]                        # (B, n_strips, 2, Wp, Cin)

    out_elem = jnp.dtype(out_dtype).itemsize
    cost = pl.CostEstimate(
        flops=2 * B * Hp * Wo * Cout * (9 * Cin + Cout),
        transcendentals=0,
        bytes_accessed=(xp.size + halos.size + w1g.size + w2b.size) * 2
        + (scale2d.size + bias2d.size + b2_2d.size) * 4
        + B * Hp * Wo * Cout * out_elem,
    )

    out = pl.pallas_call(
        _descriptor_kernel,
        out_shape=jax.ShapeDtypeStruct((B, Hp, Wo, Cout), out_dtype),
        grid_spec=pltpu.PrefetchScalarGridSpec(
            num_scalar_prefetch=0,
            grid=(B, n_strips),
            in_specs=[
                pl.BlockSpec((None, TH, Wp, Cin), lambda b, s: (b, s, 0, 0)),
                pl.BlockSpec((None, None, 2, Wp, Cin),
                             lambda b, s: (b, s, 0, 0, 0)),
                pl.BlockSpec((3, 3 * Cin, Cout), lambda b, s: (0, 0, 0)),
                pl.BlockSpec((1, Cout), lambda b, s: (0, 0)),
                pl.BlockSpec((1, Cout), lambda b, s: (0, 0)),
                pl.BlockSpec((Cout, Cout), lambda b, s: (0, 0)),
                pl.BlockSpec((1, Cout), lambda b, s: (0, 0)),
            ],
            out_specs=pl.BlockSpec((None, TH, Wo, Cout),
                                   lambda b, s: (b, s, 0, 0)),
        ),
        compiler_params=pltpu.CompilerParams(
            dimension_semantics=("parallel", "parallel"),
            vmem_limit_bytes=48 * 1024 * 1024,
        ),
        cost_estimate=cost,
    )(xp, halos, w1g, scale2d, bias2d, w2b, b2_2d)

    if Hp != H or Wo != W:
        out = out[:, :H, :W, :]
    return out


def _reference_forward(x_nhwc, params):
    """Pure-JAX f32 reference (same eval-mode BN semantics)."""
    eps = 1e-5
    y = jax.lax.conv_general_dilated(
        x_nhwc, params["w1"], window_strides=(1, 1), padding="SAME",
        dimension_numbers=("NHWC", "HWIO", "NHWC"),
    ) + params["b1"]
    scale = params["bn_gamma"] / jnp.sqrt(params["bn_var"] + eps)
    y = scale * (y - params["bn_mean"]) + params["bn_beta"]
    y = jnp.maximum(y, 0.0)
    y = jnp.einsum("bhwc,cd->bhwd", y, params["w2"]) + params["b2"]
    return y


def make_params(key, cin, cout):
    ks = jax.random.split(key, 8)
    params = {
        "w1": jax.random.normal(ks[0], (3, 3, cin, cout), jnp.float32) * 0.05,
        "b1": jax.random.normal(ks[1], (cout,), jnp.float32) * 0.01,
        "bn_gamma": 1.0 + 0.1 * jax.random.normal(ks[2], (cout,), jnp.float32),
        "bn_beta": 0.1 * jax.random.normal(ks[3], (cout,), jnp.float32),
        "bn_mean": 0.05 * jax.random.normal(ks[4], (cout,), jnp.float32),
        "bn_var": jnp.abs(0.5 + 0.1 * jax.random.normal(ks[5], (cout,), jnp.float32)),
        "w2": jax.random.normal(ks[6], (cout, cout), jnp.float32) * 0.05,
        "b2": jax.random.normal(ks[7], (cout,), jnp.float32) * 0.01,
    }
    # TODO(synk): PyTorch BatchNorm2d in .train() mode would use batch stats;
    # we implement the deployment/eval semantics (running stats folded in).
    return params


if __name__ == "__main__":
    B, H, W = 2, 16, 16
    Cin, Cout = 128, 128   # module defaults; keeps channels lane-aligned (128)

    key = jax.random.PRNGKey(0)
    kx, kp = jax.random.split(key)
    x_nchw = jax.random.normal(kx, (B, Cin, H, W), jnp.float32)  # PyTorch layout
    x_nhwc = jnp.transpose(x_nchw, (0, 2, 3, 1))                 # kernel layout

    params = make_params(kp, Cin, Cout)

    out = jax.block_until_ready(descriptor_forward(x_nhwc, params))
    ref = _reference_forward(x_nhwc, params)

    assert out.shape == (B, H, W, Cout)
    # bf16 matmul operands / bf16 output with f32 accumulation vs f32 reference.
    assert jnp.allclose(out.astype(jnp.float32), ref, atol=3e-2, rtol=3e-2)

    print("KERNEL_OK")
</pallas_src>

<mosaic_0001>
module attributes {stable_mosaic.version = 11 : i64} {
  func.func @_descriptor_kernel(%arg0: i32, %arg1: i32, %arg2: memref<1x16x24x128xbf16, #tpu.memory_space<vmem>>, %arg3: memref<1x1x2x24x128xbf16, #tpu.memory_space<vmem>>, %arg4: memref<3x384x128xbf16, #tpu.memory_space<vmem>>, %arg5: memref<1x128xf32, #tpu.memory_space<vmem>>, %arg6: memref<1x128xf32, #tpu.memory_space<vmem>>, %arg7: memref<128x128xbf16, #tpu.memory_space<vmem>>, %arg8: memref<1x128xf32, #tpu.memory_space<vmem>>, %arg9: memref<1x16x16x128xbf16, #tpu.memory_space<vmem>>) attributes {dimension_semantics = [#tpu.dimension_semantics<parallel>, #tpu.dimension_semantics<parallel>], iteration_bounds = array<i64: 2, 1>, scalar_prefetch = 0 : i64, scratch_operands = 0 : i64, tpu.core_type = #tpu.core_type<tc>, window_params = [{transform_indices = @transform_0, window_bounds = array<i64: 1, 16, 24, 128>}, {transform_indices = @transform_1, window_bounds = array<i64: 1, 1, 2, 24, 128>}, {pipeline_mode = #tpu.pipeline_mode<synchronous>, transform_indices = @transform_2, window_bounds = array<i64: 3, 384, 128>}, {pipeline_mode = #tpu.pipeline_mode<synchronous>, transform_indices = @transform_3, window_bounds = array<i64: 1, 128>}, {pipeline_mode = #tpu.pipeline_mode<synchronous>, transform_indices = @transform_4, window_bounds = array<i64: 1, 128>}, {pipeline_mode = #tpu.pipeline_mode<synchronous>, transform_indices = @transform_5, window_bounds = array<i64: 128, 128>}, {pipeline_mode = #tpu.pipeline_mode<synchronous>, transform_indices = @transform_6, window_bounds = array<i64: 1, 128>}, {transform_indices = @transform_7, window_bounds = array<i64: 1, 16, 16, 128>}]} {
    %c0 = arith.constant 0 : index
    %c0_0 = arith.constant 0 : index
    %c0_1 = arith.constant 0 : index
    %c0_2 = arith.constant 0 : index
    %0 = vector.load %arg2[%c0, %c0_0, %c0_1, %c0_2] : memref<1x16x24x128xbf16, #tpu.memory_space<vmem>>, vector<1x16x24x128xbf16>
    %1 = vector.shape_cast %0 : vector<1x16x24x128xbf16> to vector<16x24x128xbf16>
    %c0_3 = arith.constant 0 : index
    %c0_4 = arith.constant 0 : index
    %c0_5 = arith.constant 0 : index
    %c0_6 = arith.constant 0 : index
    %c0_7 = arith.constant 0 : index
    %2 = vector.load %arg3[%c0_3, %c0_4, %c0_5, %c0_6, %c0_7] : memref<1x1x2x24x128xbf16, #tpu.memory_space<vmem>>, vector<1x1x2x24x128xbf16>
    %3 = vector.shape_cast %2 : vector<1x1x2x24x128xbf16> to vector<2x24x128xbf16>
    %4 = tpu.concatenate %1, %3 in 0 : vector<16x24x128xbf16>, vector<2x24x128xbf16> -> vector<18x24x128xbf16>
    %cst = arith.constant 0.000000e+00 : f32
    %5 = vector.broadcast %cst : f32 to vector<256x128xf32>
    %6 = vector.extract_strided_slice %4 {offsets = [0, 0, 0], sizes = [18, 16, 128], strides = [1, 1, 1]} : vector<18x24x128xbf16> to vector<18x16x128xbf16>
    %7 = vector.extract_strided_slice %6 {offsets = [0, 0, 0], sizes = [16, 16, 128], strides = [1, 1, 1]} : vector<18x16x128xbf16> to vector<16x16x128xbf16>
    %8 = vector.extract_strided_slice %6 {offsets = [1, 0, 0], sizes = [16, 16, 128], strides = [1, 1, 1]} : vector<18x16x128xbf16> to vector<16x16x128xbf16>
    %9 = vector.extract_strided_slice %6 {offsets = [2, 0, 0], sizes = [16, 16, 128], strides = [1, 1, 1]} : vector<18x16x128xbf16> to vector<16x16x128xbf16>
    %10 = tpu.concatenate %7, %8, %9 in 2 : vector<16x16x128xbf16>, vector<16x16x128xbf16>, vector<16x16x128xbf16> -> vector<16x16x384xbf16>
    %11 = vector.shape_cast %10 : vector<16x16x384xbf16> to vector<256x384xbf16>
    %c0_8 = arith.constant 0 : index
    %c0_9 = arith.constant 0 : index
    %c0_10 = arith.constant 0 : index
    %12 = vector.load %arg4[%c0_8, %c0_9, %c0_10] : memref<3x384x128xbf16, #tpu.memory_space<vmem>>, vector<1x384x128xbf16>
    %13 = vector.shape_cast %12 : vector<1x384x128xbf16> to vector<384x128xbf16>
    %cst_11 = arith.constant dense<0.000000e+00> : vector<256x128xf32>
    %14 = tpu.matmul %11, %13, %cst_11 {dimension_numbers = #tpu.dot_dimension_numbers<[1], [0], [0], [1], [0, 0, 1, 1], [], []>} : vector<256x384xbf16>, vector<384x128xbf16>, vector<256x128xf32> -> vector<256x128xf32>
    %15 = arith.addf %5, %14 : vector<256x128xf32>
    %16 = vector.extract_strided_slice %4 {offsets = [0, 1, 0], sizes = [18, 16, 128], strides = [1, 1, 1]} : vector<18x24x128xbf16> to vector<18x16x128xbf16>
    %17 = vector.extract_strided_slice %16 {offsets = [0, 0, 0], sizes = [16, 16, 128], strides = [1, 1, 1]} : vector<18x16x128xbf16> to vector<16x16x128xbf16>
    %18 = vector.extract_strided_slice %16 {offsets = [1, 0, 0], sizes = [16, 16, 128], strides = [1, 1, 1]} : vector<18x16x128xbf16> to vector<16x16x128xbf16>
    %19 = vector.extract_strided_slice %16 {offsets = [2, 0, 0], sizes = [16, 16, 128], strides = [1, 1, 1]} : vector<18x16x128xbf16> to vector<16x16x128xbf16>
    %20 = tpu.concatenate %17, %18, %19 in 2 : vector<16x16x128xbf16>, vector<16x16x128xbf16>, vector<16x16x128xbf16> -> vector<16x16x384xbf16>
    %21 = vector.shape_cast %20 : vector<16x16x384xbf16> to vector<256x384xbf16>
    %c1 = arith.constant 1 : index
    %c0_12 = arith.constant 0 : index
    %c0_13 = arith.constant 0 : index
    %22 = vector.load %arg4[%c1, %c0_12, %c0_13] : memref<3x384x128xbf16, #tpu.memory_space<vmem>>, vector<1x384x128xbf16>
    %23 = vector.shape_cast %22 : vector<1x384x128xbf16> to vector<384x128xbf16>
    %cst_14 = arith.constant dense<0.000000e+00> : vector<256x128xf32>
    %24 = tpu.matmul %21, %23, %cst_14 {dimension_numbers = #tpu.dot_dimension_numbers<[1], [0], [0], [1], [0, 0, 1, 1], [], []>} : vector<256x384xbf16>, vector<384x128xbf16>, vector<256x128xf32> -> vector<256x128xf32>
    %25 = arith.addf %15, %24 : vector<256x128xf32>
    %26 = vector.extract_strided_slice %4 {offsets = [0, 2, 0], sizes = [18, 16, 128], strides = [1, 1, 1]} : vector<18x24x128xbf16> to vector<18x16x128xbf16>
    %27 = vector.extract_strided_slice %26 {offsets = [0, 0, 0], sizes = [16, 16, 128], strides = [1, 1, 1]} : vector<18x16x128xbf16> to vector<16x16x128xbf16>
    %28 = vector.extract_strided_slice %26 {offsets = [1, 0, 0], sizes = [16, 16, 128], strides = [1, 1, 1]} : vector<18x16x128xbf16> to vector<16x16x128xbf16>
    %29 = vector.extract_strided_slice %26 {offsets = [2, 0, 0], sizes = [16, 16, 128], strides = [1, 1, 1]} : vector<18x16x128xbf16> to vector<16x16x128xbf16>
    %30 = tpu.concatenate %27, %28, %29 in 2 : vector<16x16x128xbf16>, vector<16x16x128xbf16>, vector<16x16x128xbf16> -> vector<16x16x384xbf16>
    %31 = vector.shape_cast %30 : vector<16x16x384xbf16> to vector<256x384xbf16>
    %c2 = arith.constant 2 : index
    %c0_15 = arith.constant 0 : index
    %c0_16 = arith.constant 0 : index
    %32 = vector.load %arg4[%c2, %c0_15, %c0_16] : memref<3x384x128xbf16, #tpu.memory_space<vmem>>, vector<1x384x128xbf16>
    %33 = vector.shape_cast %32 : vector<1x384x128xbf16> to vector<384x128xbf16>
    %cst_17 = arith.constant dense<0.000000e+00> : vector<256x128xf32>
    %34 = tpu.matmul %31, %33, %cst_17 {dimension_numbers = #tpu.dot_dimension_numbers<[1], [0], [0], [1], [0, 0, 1, 1], [], []>} : vector<256x384xbf16>, vector<384x128xbf16>, vector<256x128xf32> -> vector<256x128xf32>
    %35 = arith.addf %25, %34 : vector<256x128xf32>
    %c0_18 = arith.constant 0 : index
    %c0_19 = arith.constant 0 : index
    %36 = vector.load %arg5[%c0_18, %c0_19] : memref<1x128xf32, #tpu.memory_space<vmem>>, vector<1x128xf32>
    %37 = vector.broadcast %36 : vector<1x128xf32> to vector<256x128xf32>
    %38 = arith.mulf %35, %37 : vector<256x128xf32>
    %c0_20 = arith.constant 0 : index
    %c0_21 = arith.constant 0 : index
    %39 = vector.load %arg6[%c0_20, %c0_21] : memref<1x128xf32, #tpu.memory_space<vmem>>, vector<1x128xf32>
    %40 = vector.broadcast %39 : vector<1x128xf32> to vector<256x128xf32>
    %41 = arith.addf %38, %40 : vector<256x128xf32>
    %cst_22 = arith.constant 0.000000e+00 : f32
    %42 = vector.broadcast %cst_22 : f32 to vector<256x128xf32>
    %43 = arith.maximumf %41, %42 : vector<256x128xf32>
    %44 = arith.truncf %43 : vector<256x128xf32> to vector<256x128xbf16>
    %c0_23 = arith.constant 0 : index
    %c0_24 = arith.constant 0 : index
    %45 = vector.load %arg7[%c0_23, %c0_24] : memref<128x128xbf16, #tpu.memory_space<vmem>>, vector<128x128xbf16>
    %cst_25 = arith.constant dense<0.000000e+00> : vector<256x128xf32>
    %46 = tpu.matmul %44, %45, %cst_25 {dimension_numbers = #tpu.dot_dimension_numbers<[1], [0], [0], [1], [0, 0, 1, 1], [], []>} : vector<256x128xbf16>, vector<128x128xbf16>, vector<256x128xf32> -> vector<256x128xf32>
    %c0_26 = arith.constant 0 : index
    %c0_27 = arith.constant 0 : index
    %47 = vector.load %arg8[%c0_26, %c0_27] : memref<1x128xf32, #tpu.memory_space<vmem>>, vector<1x128xf32>
    %48 = vector.broadcast %47 : vector<1x128xf32> to vector<256x128xf32>
    %49 = arith.addf %46, %48 : vector<256x128xf32>
    %50 = vector.shape_cast %49 : vector<256x128xf32> to vector<16x16x128xf32>
    %51 = arith.truncf %50 : vector<16x16x128xf32> to vector<16x16x128xbf16>
    %c0_28 = arith.constant 0 : index
    %c0_29 = arith.constant 0 : index
    %c0_30 = arith.constant 0 : index
    %c0_31 = arith.constant 0 : index
    %52 = vector.load %arg9[%c0_28, %c0_29, %c0_30, %c0_31] : memref<1x16x16x128xbf16, #tpu.memory_space<vmem>>, vector<1x16x16x128xbf16>
    %53 = vector.shape_cast %52 : vector<1x16x16x128xbf16> to vector<16x16x128xbf16>
    %54 = vector.shape_cast %51 : vector<16x16x128xbf16> to vector<1x16x16x128xbf16>
    tpu.vector_store %arg9[%c0_28, %c0_29, %c0_30, %c0_31], %54 {strides = array<i32>} : memref<1x16x16x128xbf16, #tpu.memory_space<vmem>>, vector<1x16x16x128xbf16>,
    return
  }
  func.func @transform_0(%arg0: i32, %arg1: i32) -> (i32, i32, i32, i32) {
    %c0_i32 = arith.constant 0 : i32
    %c0_i32_0 = arith.constant 0 : i32
    %c0_i32_1 = arith.constant 0 : i32
    return %arg0, %arg1, %c0_i32, %c0_i32_0 : i32, i32, i32, i32
  }
  func.func @transform_1(%arg0: i32, %arg1: i32) -> (i32, i32, i32, i32, i32) {
    %c0_i32 = arith.constant 0 : i32
    %c0_i32_0 = arith.constant 0 : i32
    %c0_i32_1 = arith.constant 0 : i32
    %c0_i32_2 = arith.constant 0 : i32
    return %arg0, %arg1, %c0_i32, %c0_i32_0, %c0_i32_1 : i32, i32, i32, i32, i32
  }
  func.func @transform_2(%arg0: i32, %arg1: i32) -> (i32, i32, i32) {
    %c0_i32 = arith.constant 0 : i32
    %c0_i32_0 = arith.constant 0 : i32
    %c0_i32_1 = arith.constant 0 : i32
    %c0_i32_2 = arith.constant 0 : i32
    return %c0_i32, %c0_i32_0, %c0_i32_1 : i32, i32, i32
  }
  func.func @transform_3(%arg0: i32, %arg1: i32) -> (i32, i32) {
    %c0_i32 = arith.constant 0 : i32
    %c0_i32_0 = arith.constant 0 : i32
    %c0_i32_1 = arith.constant 0 : i32
    return %c0_i32, %c0_i32_0 : i32, i32
  }
  func.func @transform_4(%arg0: i32, %arg1: i32) -> (i32, i32) {
    %c0_i32 = arith.constant 0 : i32
    %c0_i32_0 = arith.constant 0 : i32
    %c0_i32_1 = arith.constant 0 : i32
    return %c0_i32, %c0_i32_0 : i32, i32
  }
  func.func @transform_5(%arg0: i32, %arg1: i32) -> (i32, i32) {
    %c0_i32 = arith.constant 0 : i32
    %c0_i32_0 = arith.constant 0 : i32
    %c0_i32_1 = arith.constant 0 : i32
    return %c0_i32, %c0_i32_0 : i32, i32
  }
  func.func @transform_6(%arg0: i32, %arg1: i32) -> (i32, i32) {
    %c0_i32 = arith.constant 0 : i32
    %c0_i32_0 = arith.constant 0 : i32
    %c0_i32_1 = arith.constant 0 : i32
    return %c0_i32, %c0_i32_0 : i32, i32
  }
  func.func @transform_7(%arg0: i32, %arg1: i32) -> (i32, i32, i32, i32) {
    %c0_i32 = arith.constant 0 : i32
    %c0_i32_0 = arith.constant 0 : i32
    %c0_i32_1 = arith.constant 0 : i32
    return %arg0, %arg1, %c0_i32, %c0_i32_0 : i32, i32, i32, i32
  }
}

</mosaic_0001>

<bundles_post_ra>
// kernel: tpu_custom_call.1
= control target key start
LH: loop header
LB: loop body
LE: loop exit
PB: predicated region body
PF: predicated region fallthrough
CT: control target
= control target key end

     0   :  { %s5630_s0 = inlined_call_operand.hbm [shape: bf16[2,18,24,128], index: 0, kind: input, shape index: {}]   ;;  %s5631_s1 = inlined_call_operand.hbm [shape: bf16[2,1,2,24,128], index: 1, kind: input, shape index: {}]   ;;  %s5632_s2 = inlined_call_operand.hbm [shape: bf16[3,384,128], index: 2, kind: input, shape index: {}]   ;;  %s5633_s3 = inlined_call_operand.vmem [shape: f32[1,128], index: 3, kind: input, shape index: {}]   ;;  %s5634_s4 = inlined_call_operand.vmem [shape: f32[1,128], index: 4, kind: input, shape index: {}]   ;;  %s5635_s5 = inlined_call_operand.hbm [shape: bf16[128,128], index: 5, kind: input, shape index: {}]   ;;  %s5636_s6 = inlined_call_operand.vmem [shape: f32[1,128], index: 6, kind: input, shape index: {}]   ;;  %s5637_s7 = inlined_call_operand.hbm [shape: bf16[2,16,16,128], index: 7, kind: output, shape index: {}]  }
   0x1   :  { %5647 = sst [smem:[#allocation21_spill]] %s5630_s0 }
   0x2   :  { %5648 = sst [smem:[#allocation22_spill]] %s5632_s2 }
   0x3   :  { %5649 = sst [smem:[#allocation23_spill]] %s5635_s5 }
   0x4   :  { %5650 = sst [smem:[#allocation24_spill]] %s5637_s7 }
   0x5   :  { %12 = vsyncpa [#allocation3], 0 }
   0x6   :  { %14 = vsyncpa [#allocation3 + $0x1], 0 }
   0x7   :  { %15 = vsyncpa [#allocation6], 0 }
   0x8   :  { %17 = vsyncpa [#allocation6 + $0x1], 0 }
   0x9   :  { %18 = vsyncpa [#allocation9], 0 }
   0xa   :  { %19 = vsyncpa [#allocation4], 0 }
   0xb   :  { %21 = vsyncpa [#allocation4 + $0x1], 0  ;;  %s4565_s24 = smov 0   ;;  %s4567_s25 = smov 0  }
   0xc   :  { %s4569_s26 = smov 0   ;;  %s4571_s27 = smov 0  }
   0xd   :  { %s4573_s28 = smov 0   ;;  %s4575_s29 = smov 0  }
   0xe LB: > { %5651 = sst [smem:[#allocation16_spill]] %s4494_s24  ;;  %s4596_s30 = sadd.s32 4294967295, %s4514_s29   ;;  %s4514_s29 = sphi %s4575_s29, %s27_s29   ;;  %s4510_s28 = sphi %s4573_s28, %s5677_s28   ;;  %s4506_s27 = sphi %s4571_s27, %s5676_s27   ;;  %s4502_s26 = sphi %s4569_s26, %s5672_s26   ;;  %s4498_s25 = sphi %s4567_s25, %s5675_s25   ;;  %s4494_s24 = sphi %s4565_s24, %s5674_s24  }
   0xf   : > { %5652 = sst [smem:[#allocation17_spill]] %s4502_s26  ;;  %s3173_s8 = sadd.s32 4294967294, %s4514_s29  }
  0x10   : > { %p61_p0 = scmp.ne.s32.totalorder %s4498_s25, %s4494_s24  ;;  %p62_p1 = scmp.eq.s32.totalorder %s4596_s30, 0 }
  0x11   : > { %p220_p2 = scmp.eq.s32.totalorder %s4596_s30, 1  ;;  %p226_p3 = scmp.eq.s32.totalorder %s3173_s8, 1 }
  0x12   : > { %p4605_p4 = por %p62_p1, %p61_p0  ;;  %p3174_p5 = scmp.ge.s32.totalorder %s4514_s29, 1 }
  0x13   : > { %p4610_p6 = por %p226_p3, %p61_p0  ;;  %p233_p7 = scmp.lt.s32.totalorder %s4514_s29, 3 }
  0x14   : > { %s4516_s12 = smov [#allocation7]   ;;  %s4517_s15 = smov [#allocation8]  }
  0x15   : > { %s5654_s10 = scalar_select %p4610_p6, 1, 0 }
  0x16   : > { %p4615_p8 = pnand %p3174_p5, %p233_p7  ;;  %s245_s13 = sshll.u32 %s4516_s12, 4  ;;  %s246_s13 = int_to_ptr.vmem [resolvable:$true] %s245_s13 }
  0x17   : > { %5655 = sst [smem:[#allocation18_spill]] %s5654_s10  ;;  %s264_s16 = sshll.u32 %s4517_s15, 4  ;;  %s265_s16 = int_to_ptr.vmem [resolvable:$true] %s264_s16 }
  0x18   : > { %p4112_p9 = pneg %p4615_p8  ;;  %s4325_s17 = scalar_lea.vmem %s246_s13, 9216 }
  0x19   : > { %p4326_p13 = scmp.ne.s32.totalorder %s246_s13, %s4325_s17  ;;  %p4333_p5 = scmp.lt.s32.totalorder %s246_s13, %s246_s13 }
  0x1a   : > { %p4624_p11 = pnand %p4112_p9, %p62_p1  ;;  %p4334_p7 = scmp.lt.s32.totalorder %s4325_s17, %s4325_s17 }
  0x1c   : > { %p4316_p12 = pneg %p4624_p11  ;;  %p4335_p10 = por %p4334_p7, %p4333_p5 }
  0x1e   : > { %p4328_p0 = pnand %p4326_p13, %p4316_p12 }
  0x20   : > { %p4329_p3 = pneg %p4328_p0 }
  0x22   : > { %p4336_p9 = pnand %p4335_p10, %p4329_p3 }
  0x24   : > { %4339 = shalt.err (!%p4336_p9)
}
  0x25   : > { %s5638_s18 = smov 64   ;;  %s5640_s19 = smov 4  }
  0x26   : > { %s5658_s2 = sld [smem:[#allocation22_spill]]  ;;  %s4351_s22 = scalar_lea.vmem %s265_s16, 1024 }
  0x27   : > { %p4352_p13 = scmp.ne.s32.totalorder %s265_s16, %s4351_s22  ;;  %p4359_p10 = scmp.lt.s32.totalorder %s265_s16, %s265_s16 }
  0x28   : > { %p4360_p3 = scmp.lt.s32.totalorder %s4351_s22, %s4351_s22 }
  0x29   : > { %p4354_p0 = pnand %p4352_p13, %p4316_p12 }
  0x2a   : > { %p4361_p7 = por %p4360_p3, %p4359_p10 }
  0x2b   : > { %p4355_p5 = pneg %p4354_p0 }
  0x2c   : > { %4115 = dma.hbm_to_vmem [thread:$0]  (!%p4624_p11), %s5658_s2, 9216, %s246_s13, [#allocation6], %s5638_s18, %s5638_s18, %s5640_s19  }
  0x2d   : > { %p4362_p9 = pnand %p4361_p7, %p4355_p5 }
  0x2f   : > { %4365 = shalt.err (!%p4362_p9)
}
  0x30   : > { %s5659_s5 = sld [smem:[#allocation23_spill]]  ;;  %s39_s12 = sadd.s32 1, %s4510_s28 }
  0x31   : > { %s48_s13 = sadd.s32 1, %s4502_s26  ;;  %p41_p12 = scmp.ge.s32.totalorder %s39_s12, 2 }
  0x32   : > { %p55_p13 = scmp.ne.s32.totalorder %s4502_s26, %s4498_s25  ;;  %p56_p0 = scmp.eq.s32.totalorder %s4514_s29, 0 }
  0x33   : > { %p4132_p5 = scmp.lt.s32.totalorder %s4514_s29, 2  ;;  %s5679_s12 = smov (%p41_p12, %s39_s12), 0 }
  0x34   : > { %5660 = sst [smem:[#allocation19_spill]] %s5679_s12  ;;  %p57_p10 = por %p56_p0, %p55_p13 }
  0x35   : > { %p4662_p3 = por %p220_p2, %p55_p13  ;;  %s43_s15 = ssub.s32 %s4510_s28, %s5679_s12 }
  0x36   : > { %4118 = dma.hbm_to_vmem [thread:$0]  (!%p4624_p11), %s5659_s5, 1024, %s265_s16, [#allocation9], %s5638_s18, %s5638_s18, %s5640_s19  }
  0x37   : > { %s4669_s17 = sand.u32 1, %s4502_s26   ;;  %p46_p11 = scmp.eq.s32.totalorder %s43_s15, 0 }
  0x38   : > { %s4092_s16 = smul.u32 192, %s4669_s17  ;;  %p4672_p7 = pnand %p4132_p5, %p57_p10 }
  0x39   : > { %s4677_s21 = scalar_select %p46_p11, %s4502_s26, %s48_s13  }
  0x3a   : > { %s4093_s22 = smul.u32 3456, %s4510_s28  ;;  %s285_s23 = scalar_lea.vmem [#allocation2], %s4092_s16 }
  0x3b   : > { %5663 = sst [smem:[#allocation20_spill]] %s4677_s21  ;;  %s303_s8 = sshll.u32 %s285_s23, 4  ;;  %s304_s8 = int_to_ptr.vmem [resolvable:$true] %s303_s8 }
  0x3c   : > { %s5664_s0 = sld [smem:[#allocation21_spill]]  ;;  %s282_s5 = scalar_lea.sflag [#allocation3], %s4669_s17 }
  0x3d   : > { %p4368_p2 = pneg %p4672_p7  ;;  %s4379_s15 = scalar_lea.vmem %s304_s8, 3072 }
  0x3e   : > { %p4380_p9 = scmp.ne.s32.totalorder %s304_s8, %s4379_s15  ;;  %s4520_s12 = smov [#allocation2]  }
  0x3f   : > { %s4384_s13 = sshll.u32 %s4520_s12, 4  ;;  %s4385_s13 = int_to_ptr.vmem [resolvable:$false] %s4384_s13 }
  0x40   : > { %p4382_p12 = pnand %p4380_p9, %p4368_p2  ;;  %s4386_s21 = scalar_lea.vmem %s4385_s13, 6144 }
  0x41   : > { %p4387_p0 = scmp.lt.s32.totalorder %s304_s8, %s4385_s13  ;;  %p4388_p5 = scmp.lt.s32.totalorder %s4386_s21, %s4379_s15 }
  0x42   : > { %s300_s2 = scalar_lea.hbm %s5664_s0, %s4093_s22  ;;  %p4383_p13 = pneg %p4382_p12 }
  0x43   : > { %p4389_p10 = por %p4388_p5, %p4387_p0 }
  0x45   : > { %p4390_p11 = pnand %p4389_p10, %p4383_p13 }
  0x47   : > { %4393 = shalt.err (!%p4390_p11)
}
  0x48   : > { %s5665_s18 = smov 4   ;;  %s5666_s19 = smov 64  }
  0x49   : > { %4122 = dma.hbm_to_vmem [thread:$0]  (!%p4672_p7), %s300_s2, 3072, %s304_s8, %s282_s5, %s5666_s19, %s5666_s19, %s5665_s18  }
  0x4a   : > { %s313_s16 = sand.u32 1, %s4514_s29   ;;  %s4094_s22 = smul.u32 24, %s4669_s17 }
  0x4b   : > { %s4095_s12 = smul.u32 384, %s4510_s28  ;;  %s314_s26 = scalar_lea.sflag [#allocation6], %s313_s16 }
  0x4c   : > { %s317_s15 = scalar_lea.vmem [#allocation5], %s4094_s22  ;;  %s4521_s24 = smov [#allocation5]  }
  0x4d   : > { %s325_s21 = scalar_lea.hbm %s5631_s1, %s4095_s12  ;;  %s326_s13 = sshll.u32 %s317_s15, 4  ;;  %s327_s13 = int_to_ptr.vmem [resolvable:$true] %s326_s13 }
  0x4e   : > { %s4407_s10 = scalar_lea.vmem %s327_s13, 384  ;;  %s4412_s7 = sshll.u32 %s4521_s24, 4  ;;  %s4413_s7 = int_to_ptr.vmem [resolvable:$false] %s4412_s7 }
  0x4f   : > { %p4408_p9 = scmp.ne.s32.totalorder %s327_s13, %s4407_s10  ;;  %s4414_s2 = scalar_lea.vmem %s4413_s7, 768 }
  0x50   : > { %p4415_p0 = scmp.lt.s32.totalorder %s327_s13, %s4413_s7  ;;  %p4416_p5 = scmp.lt.s32.totalorder %s4414_s2, %s4407_s10 }
  0x51   : > { %p4410_p12 = pnand %p4408_p9, %p4368_p2 }
  0x52   : > { %p4417_p10 = por %p4416_p5, %p4415_p0 }
  0x53   : > { %p4411_p13 = pneg %p4410_p12 }
  0x55   : > { %p4418_p11 = pnand %p4417_p10, %p4411_p13 }
  0x57   : > { %4421 = shalt.err (!%p4418_p11)
}
  0x58   : > { %4125 = dma.hbm_to_vmem [thread:$0]  (!%p4672_p7), %s325_s21, 384, %s327_s13, %s314_s26, %s5666_s19, %s5666_s19, %s5665_s18  }
  0x59   : > { %338 = sbr.rel (%p4615_p8) target bundleno = 879 (0x36f), region = 48  ;;  %s4711_s0 = sand.u32 (!%p4615_p8), 1, %s4498_s25  }
  0x5a   : > { %s4096_s5 = smul.u32 (!%p4615_p8), 192, %s4711_s0  ;;  %s341_s7 = scalar_lea.sflag (!%p4615_p8), [#allocation3], %s4711_s0 }
  0x5c   : > { %s4715_s24 = scalar_lea.vmem (!%p4615_p8), [#allocation2], %s4096_s5 }
  0x5e   : > { %4473 = dma.done.wait (%p4605_p4), %s341_s7, 3072  }
  0x5f   : > { %4475 = vsyncadd (%p4605_p4), %s341_s7, 4294964224  ;;  %s349_s26 = sand.u32 1, %s4596_s30   ;;  %s4097_s10 = smul.u32 24, %s4711_s0 }
  0x60   : > { %s350_s11 = scalar_lea.sflag [#allocation6], %s349_s26 }
  0x61   : > { %s4723_s17 = scalar_lea.vmem [#allocation5], %s4097_s10 }
  0x62   : > { %4477 = dma.done.wait (%p4605_p4), %s350_s11, 384  }
  0x63   : > { %4479 = vsyncadd (%p4605_p4), %s350_s11, 4294966912 }
  0x64   : > { %4481 = dma.done.wait (%p62_p1), [#allocation6], 9216  }
  0x65   : > { %4483 = vsyncadd (%p62_p1), [#allocation6], 4294958080 }
  0x66   : > { %4485 = dma.done.wait (%p62_p1), [#allocation9], 1024  }
  0x67   : > { %4487 = vsyncadd (%p62_p1), [#allocation9], 4294966272  ;;  %v4190_v0 = vld [vmem:[#allocation7 + $0x138] sm:$0xff]   ;;  %v4193_v3 = vld [vmem:[#allocation7 + $0x130] sm:$0xff]   ;;  %vm669_vm0 = vsmask.f32 7424 }
  0x68   : > { %v4191_v1 = vld [vmem:[#allocation7 + $0x178] sm:$0xff]   ;;  %3468 = vmatprep.subr.bf16.mxu0 %v4190_v0  ;;  %v4194_v4 = vld [vmem:[#allocation7 + $0x170] sm:$0xff]   ;;  %v4196_v6 = vld [vmem:[#allocation7 + $0x128] sm:$0xff]   ;;  %vm1885_vm1 = vcmask 1046528   ;;  %s3183_s16 = sshll.u32 %s4711_s0, 7  ;;  %s3372_s12 = sshll.u32 %s4506_s27, 11 }
  0x69   : > { %v4192_v2 = vld [vmem:[#allocation7 + $0xf8] sm:$0xff]   ;;  %3900 = vmatprep.subr.bf16.mxu1 %v4191_v1  ;;  %v4195_v5 = vld [vmem:[#allocation7 + $0xf0] sm:$0xff]   ;;  %v4197_v7 = vld [vmem:[#allocation7 + $0x168] sm:$0xff]   ;;  %s5529_s22 = scalar_lea.vmem [#allocation10], %s3183_s16  ;;  %s5667_s13 = sld [smem:[#allocation24_spill]] }
  0x6a   : > { %3469 = vmatpush3.bf16.msra.mxu0 %v4192_v2  ;;  %3901 = vmatpush3.bf16.msra.mxu1 %v4191_v1  ;;  %v4198_v8 = vld [vmem:[#allocation7 + $0xe8] sm:$0xff]   ;;  %v4199_v9 = vld [vmem:[#allocation7 + $0x120] sm:$0xff]   ;;  %v4202_v12 = vld [vmem:[#allocation7 + $0x118] sm:$0xff]   ;;  %s3040_s23 = sshll.u32 %s5529_s22, 4  ;;  %s3024_s27 = scalar_lea.sflag [#allocation4], %s4711_s0  ;;  %s5580_s23 = int_to_ptr.vmem [resolvable:$true] %s3040_s23 }
  0x6b   : > { %3470 = vmatprep.subr.bf16.mxu0 %v4193_v3  ;;  %3902 = vmatprep.subr.bf16.mxu1 %v4194_v4  ;;  %v4200_v10 = vld [vmem:[#allocation7 + $0x160] sm:$0xff]   ;;  %v4203_v13 = vld [vmem:[#allocation7 + $0x158] sm:$0xff]   ;;  %v4205_v15 = vld [vmem:[#allocation7 + $0x110] sm:$0xff]   ;;  %s4422_s5 = scalar_lea.vmem %s5580_s23, 2048  ;;  %s4522_s7 = smov [#allocation10]  }
  0x6c   : > { %v4201_v11 = vld [vmem:[#allocation7 + $0xe0] sm:$0xff]   ;;  %v4204_v14 = vld [vmem:[#allocation7 + $0xd8] sm:$0xff]   ;;  %v4206_v16 = vld [vmem:[#allocation7 + $0x150] sm:$0xff]   ;;  %p4423_p1 = scmp.ne.s32.totalorder %s5580_s23, %s4422_s5 }
  0x6d   : > { %v4207_v17 = vld [vmem:[#allocation7 + $0xd0] sm:$0xff]   ;;  %v4208_v18 = vld [vmem:[#allocation7 + $0x108] sm:$0xff]   ;;  %v4211_v21 = vld [vmem:[#allocation7 + $0x100] sm:$0xff]  }
  0x6e   : > { %3471 = vmatpush3.bf16.msra.mxu0 %v4195_v5  ;;  %3903 = vmatpush3.bf16.msra.mxu1 %v4194_v4  ;;  %v4209_v19 = vld [vmem:[#allocation7 + $0x148] sm:$0xff]   ;;  %v4212_v22 = vld [vmem:[#allocation7 + $0x140] sm:$0xff]   ;;  %v4217_v30 = vld [vmem:[%s4715_s24 + $0x20] ss:$0 sps:$4 sm:$0xff]   ;;  %p4424_p4 = pnand %p4423_p1, %p4662_p3 }
  0x6f   : > { %3472 = vmatprep.subr.bf16.mxu0 %v4196_v6  ;;  %3904 = vmatprep.subr.bf16.mxu1 %v4197_v7  ;;  %v4210_v20 = vld [vmem:[#allocation7 + $0xc8] sm:$0xff]   ;;  %v4738_v23 = vld [vmem:[%s4715_s24 + $0xc] sm:$0xff]   ;;  %v4215_v24 = vld [vmem:[%s4715_s24 + $0x14] ss:$0 sps:$4 sm:$0xff]   ;;  %v702_v36 = vshll.u32 %v4217_v30, 16  ;;  %s5578_s2 = scalar_lea.hbm %s5667_s13, %s3372_s12 }
  0x70   : > { %v4213_v25 = vld [vmem:[#allocation7 + $0xc0] sm:$0xff]   ;;  %v4742_v26 = vld [vmem:[%s4715_s24 + $0x18] sm:$0xff]   ;;  %v683_v27 = vshrl.u32 %v4738_v23, 16  ;;  %v685_v28 = vshll.u32 %v4738_v23, 16  ;;  %v690_v29 = vshll.u32 %v4215_v24, 16  ;;  %v4748_v31 = vld [vmem:[%s4715_s24] sm:$0xff]   ;;  %p4425_p8 = pneg %p4424_p4 }
  0x71   : > { %v695_v32 = vshrl.u32 %v4742_v26, 16  ;;  %v697_v33 = vshll.u32 %v4742_v26, 16  ;;  %v671_v37 = vshrl.u32 %v4748_v31, 16  ;;  %v4219_v39 = vld [vmem:[%s4715_s24 + $0x8] ss:$0 sps:$4 sm:$0xff]   ;;  %v673_v40 = vshll.u32 %v4748_v31, 16 }
  0x72   : > { %3473 = vmatpush3.bf16.msra.mxu0 %v4198_v8  ;;  %3905 = vmatpush3.bf16.msra.mxu1 %v4197_v7  ;;  %v687_v34 = vrot.slane %v685_v28, 1  ;;  %v692_v35 = vrot.slane %v690_v29, 1  ;;  %v704_v42 = vrot.slane %v702_v36, 1  ;;  %v4756_v43 = vld [vmem:[%s4715_s24 + $0x24] sm:$0xff]   ;;  %v678_v46 = vshll.u32 %v4219_v39, 16  ;;  %v4763_v52 = vld [vmem:[%s4715_s24 + $0x30] sm:$0xff]  }
  0x73   : > { %3474 = vmatprep.subr.bf16.mxu0 %v4199_v9  ;;  %3906 = vmatprep.subr.bf16.mxu1 %v4200_v10  ;;  %v699_v38 = vrot.slane %v697_v33, 1  ;;  %v675_v45 = vrot.slane %v673_v40, 1  ;;  %v4221_v47 = vld [vmem:[%s4715_s24 + $0x2c] ss:$0 sps:$4 sm:$0xff]   ;;  %v707_v49 = vshrl.u32 %v4756_v43, 16  ;;  %v709_v50 = vshll.u32 %v4756_v43, 16 }
  0x74   : > { %v688_v41 = vor.u32 %v687_v34, %v683_v27  ;;  %v4222_v51 = vld [vmem:[#allocation7 + $0xb8] sm:$0xff]   ;;  %v680_v55 = vrot.slane %v678_v46, 1  ;;  %v714_v56 = vshll.u32 %v4221_v47, 16  ;;  %v4770_v58 = vld [vmem:[%s4715_s24 + $0x38] ss:$0 sps:$4 sm:$0xff]   ;;  %v719_v59 = vshrl.u32 %v4763_v52, 16 }
  0x75   : > { %v700_v44 = vor.u32 %v699_v38, %v695_v32  ;;  %v676_v54 = vor.u32 %v675_v45, %v671_v37  ;;  %v711_v57 = vrot.slane %v709_v50, 1  ;;  %v721_v62 = vshll.u32 %v4763_v52, 16  ;;  %v4777_v1 = vld [vmem:[%s4715_s24 + $0x3c] sm:$0xff]   ;;  %v4780_v2 = vld [vmem:[%s4715_s24 + $0x44] ss:$0 sps:$4 sm:$0xff]   ;;  %v4784_v4 = vld [vmem:[%s4715_s24 + $0x48] sm:$0xff]  }
  0x76   : > { %3475 = vmatpush3.bf16.msra.mxu0 %v4201_v11  ;;  %3907 = vmatpush3.bf16.msra.mxu1 %v4200_v10  ;;  %v693_v48 = vsel %vm669_vm0, %v688_v41, %v692_v35  ;;  %v716_v61 = vrot.slane %v714_v56, 1  ;;  %v726_v0 = vshll.u32 %v4770_v58, 16  ;;  %v731_v7 = vshrl.u32 %v4777_v1, 16  ;;  %v4792_v9 = vld [vmem:[%s4715_s24 + $0x54] sm:$0xff]   ;;  %v4810_v24 = vld [vmem:[%s4715_s24 + $0x5c] ss:$0 sps:$4 sm:$0xff]  }
  0x77   : > { %3476 = vmatprep.subr.bf16.mxu0 %v4202_v12  ;;  %3908 = vmatprep.subr.bf16.mxu1 %v4203_v13  ;;  %v4766_v53 = vsel %vm669_vm0, %v700_v44, %v704_v42  ;;  %v681_v60 = vsel %vm669_vm0, %v676_v54, %v680_v55  ;;  %v712_v63 = vor.u32 %v711_v57, %v707_v49  ;;  %v723_v3 = vrot.slane %v721_v62, 1  ;;  %v4797_v12 = vld [vmem:[%s4715_s24 + $0x50] ss:$0 sps:$4 sm:$0xff]   ;;  %v4826_v36 = vld [vmem:[%s4715_s24 + $0x68] ss:$0 sps:$4 sm:$0xff]   ;;  %v4839_v47 = vld [vmem:[%s4715_s24 + $0x78] sm:$0xff]  }
  0x78   : > { %1129 = vmatprep.mubr.bf16.mxu0 %v693_v48  ;;  %3916 = vmatprep.mubr.bf16.mxu1 %v4766_v53  ;;  %v728_v6 = vrot.slane %v726_v0, 1  ;;  %v733_v8 = vshll.u32 %v4777_v1, 16  ;;  %v738_v11 = vshll.u32 %v4780_v2, 16  ;;  %v4814_v27 = vld [vmem:[%s4715_s24 + $0x6c] sm:$0xff]   ;;  %v755_v30 = vshrl.u32 %v4792_v9, 16  ;;  %v4241_v0 = vld [vmem:[#allocation7 + $0xa8] sm:$0xff]  }
  0x79   : > { %v4787_v5 = vsel %vm669_vm0, %v712_v63, %v716_v61  ;;  %v724_v10 = vor.u32 %v723_v3, %v719_v59  ;;  %v762_v34 = vshll.u32 %v4810_v24, 16  ;;  %v779_v39 = vshrl.u32 %v4814_v27, 16  ;;  %v4835_v44 = vld [vmem:[%s4715_s24 + $0x74] ss:$0 sps:$4 sm:$0xff]   ;;  %v4849_v59 = vld [vmem:[%s4715_s24 + $0x84] sm:$0xff]  }
  0x7a   : > { %3477 = vmatpush3.bf16.msra.mxu0 %v4204_v14  ;;  %3909 = vmatpush3.bf16.msra.mxu1 %v4203_v13  ;;  %v743_v13 = vshrl.u32 %v4784_v4, 16  ;;  %v745_v14 = vshll.u32 %v4784_v4, 16  ;;  %v781_v40 = vshll.u32 %v4814_v27, 16  ;;  %v774_v42 = vshll.u32 %v4826_v36, 16  ;;  %v4240_v61 = vld [vmem:[#allocation7 + $0x78] sm:$0xff]  }
  0x7b   : > { %3478 = vmatprep.subr.bf16.mxu0 %v4205_v15  ;;  %3910 = vmatprep.subr.bf16.mxu1 %v4206_v16  ;;  %v4231_v15 = vld [vmem:[#allocation7 + $0xb0] sm:$0xff]   ;;  %v764_v46 = vrot.slane %v762_v34, 1  ;;  %v786_v50 = vshll.u32 %v4835_v44, 16  ;;  %v793_v55 = vshll.u32 %v4839_v47, 16  ;;  %v791_v56 = vshrl.u32 %v4839_v47, 16 }
  0x7c   : > { %v776_v49 = vrot.slane %v774_v42, 1  ;;  %v783_v54 = vrot.slane %v781_v40, 1  ;;  %v4884_v34 = vld [vmem:[%s4715_s24 + $0xa4] ss:$0 sps:$4 sm:$0xff]  }
  0x7d   : > { %v788_v63 = vrot.slane %v786_v50, 1  ;;  %v4895_v50 = vld [vmem:[%s4715_s24 + $0xa8] sm:$0xff]  }
  0x7e   : > { %3479 = vmatpush3.bf16.msra.mxu0 %v4207_v17  ;;  %3911 = vmatpush3.bf16.msra.mxu1 %v4206_v16  ;;  %v735_v16 = vrot.slane %v733_v8, 1  ;;  %v4802_v17 = vsel %vm669_vm0, %v724_v10, %v728_v6  ;;  %v795_v6 = vrot.slane %v793_v55, 1  ;;  %v805_v8 = vshll.u32 %v4849_v59, 16  ;;  %v4242_v10 = vld [vmem:[#allocation7 + $0x38] sm:$0xff]  }
  0x7f   : > { %3480 = vmatprep.subr.bf16.mxu0 %v4208_v18  ;;  %3912 = vmatprep.subr.bf16.mxu1 %v4209_v19  ;;  %v740_v18 = vrot.slane %v738_v11, 1  ;;  %v4243_v11 = vld [vmem:[#allocation7 + $0x70] sm:$0xff]  }
  0x82   : > { %3481 = vmatpush3.bf16.msra.mxu0 %v4210_v20  ;;  %3913 = vmatpush3.bf16.msra.mxu1 %v4209_v19  ;;  %v747_v19 = vrot.slane %v745_v14, 1  ;;  %v750_v20 = vshll.u32 %v4797_v12, 16  ;;  %v4244_v14 = vld [vmem:[#allocation7 + $0x30] sm:$0xff]  }
  0x83   : > { %3482 = vmatprep.subr.bf16.mxu0 %v4211_v21  ;;  %3914 = vmatprep.subr.bf16.mxu1 %v4212_v22  ;;  %v4806_v21 = vld [vmem:[%s4715_s24 + $0x60] sm:$0xff]  }
  0x84   : > { %v748_v28 = vor.u32 %v747_v19, %v743_v13  ;;  %v752_v29 = vrot.slane %v750_v20, 1  ;;  %v767_v37 = vshrl.u32 %v4806_v21, 16  ;;  %v769_v38 = vshll.u32 %v4806_v21, 16  ;;  %v4871_v20 = vld [vmem:[%s4715_s24 + $0x98] ss:$0 sps:$4 sm:$0xff]  }
  0x85   : > { %v796_v19 = vor.u32 %v795_v6, %v791_v56  ;;  %v841_v56 = vshll.u32 %v4895_v50, 16  ;;  %v4909_v6 = vld [vmem:[%s4715_s24 + $0xb4] sm:$0xff]  }
  0x86   : > { %3483 = vmatpush3.bf16.msra.mxu0 %v4213_v25  ;;  %3915 = vmatpush3.bf16.msra.mxu1 %v4212_v22  ;;  %v736_v22 = vor.u32 %v735_v16, %v731_v7  ;;  %v757_v25 = vshll.u32 %v4792_v9, 16  ;;  %v4823_v35 = vsel %vm669_vm0, %v748_v28, %v752_v29  ;;  %v771_v41 = vrot.slane %v769_v38, 1 }
  0x87   : > { %3948 = vmatprep.subr.bf16.mxu0 %v4222_v51  ;;  %3604 = vmatprep.subr.bf16.mxu1 %v4240_v61  ;;  %v807_v16 = vrot.slane %v805_v8, 1  ;;  %v843_v8 = vrot.slane %v841_v56, 1  ;;  %v4945_v56 = vld [vmem:[%s4723_s17 + $0x14] ss:$0 sps:$4 sm:$0xff]  }
  0x88   : > { %v4818_v32 = vsel %vm669_vm0, %v736_v22, %v740_v18  ;;  %v759_v33 = vrot.slane %v757_v25, 1  ;;  %v4868_v18 = vld [vmem:[%s4715_s24 + $0x90] sm:$0xff]  }
  0x89   : > { %1130 = vmatmul.mubr.bf16.vlgmr.msra.gmra.mxu0 %v681_v60  ;;  %3917 = vmatmul.mubr.bf16.vlgmr.msra.gmra.mxu1 %v4787_v5  ;;  %v4852_v60 = vld [vmem:[%s4715_s24 + $0x8c] ss:$0 sps:$4 sm:$0xff]   ;;  %v815_v22 = vshrl.u32 %v4868_v18, 16  ;;  %v817_v25 = vshll.u32 %v4868_v18, 16 }
  0x8a   : > { %3949 = vmatpush3.bf16.msra.mxu0 %v4222_v51  ;;  %1137 = vmatprep.mubr.bf16.mxu0 %v4766_v53  ;;  %v760_v45 = vor.u32 %v759_v33, %v755_v30  ;;  %v4843_v51 = vld [vmem:[%s4715_s24 + $0x80] ss:$0 sps:$4 sm:$0xff]   ;;  %v810_v13 = vshll.u32 %v4852_v60, 16  ;;  %v822_v30 = vshll.u32 %v4871_v20, 16 }
  0x8b   : > { %3950 = vmatprep.subr.bf16.mxu0 %v4231_v15  ;;  %3920 = vmatprep.mubr.bf16.mxu1 %v4802_v17  ;;  %v798_v57 = vshll.u32 %v4843_v51, 16  ;;  %v819_v29 = vrot.slane %v817_v25, 1  ;;  %v4881_v33 = vld [vmem:[%s4715_s24 + $0x9c] sm:$0xff]  }
  0x8c   : > { %v4856_v62 = vsel %vm669_vm0, %v760_v45, %v764_v46  ;;  %3605 = vmatpush3.bf16.msra.mxu1 %v4242_v10  ;;  %v824_v40 = vrot.slane %v822_v30, 1  ;;  %v829_v45 = vshll.u32 %v4881_v33, 16  ;;  %v4252_v46 = vld [vmem:[#allocation7 + $0x20] sm:$0xff]   ;;  %v827_v55 = vshrl.u32 %v4881_v33, 16  ;;  %v4257_v10 = vld [vmem:[#allocation7 + $0x58] sm:$0xff]   ;;  %v4261_v30 = vld [vmem:[#allocation7 + $0x10] sm:$0xff]  }
  0x8d   : > { %v800_v7 = vrot.slane %v798_v57, 1  ;;  %3606 = vmatprep.subr.bf16.mxu1 %v4243_v11  ;;  %v853_v11 = vshll.u32 %v4909_v6, 16 }
  0x8e   : > { %3951 = vmatpush3.bf16.msra.mxu0 %v4231_v15  ;;  %v784_v15 = vor.u32 %v783_v54, %v779_v39  ;;  %v4250_v39 = vld [vmem:[#allocation7 + $0x28] sm:$0xff]   ;;  %v4898_v54 = vld [vmem:[%s4715_s24 + $0xb0] ss:$0 sps:$4 sm:$0xff]   ;;  %v831_v61 = vrot.slane %v829_v45, 1 }
  0x8f   : > { %3952 = vmatprep.subr.bf16.mxu0 %v4241_v0  ;;  %v4888_v38 = vsel %vm669_vm0, %v796_v19, %v800_v7  ;;  %v4259_v19 = vld [vmem:[#allocation7 + $0x18] sm:$0xff]  }
  0x90   : > { %v4877_v28 = vsel %vm669_vm0, %v784_v15, %v788_v63  ;;  %3607 = vmatpush3.bf16.msra.mxu1 %v4244_v14  ;;  %v839_v63 = vshrl.u32 %v4895_v50, 16  ;;  %v832_v14 = vor.u32 %v831_v61, %v827_v55 }
  0x91   : > { %1138 = vmatmul.mubr.bf16.gmra.mxu0 %v693_v48  ;;  %3921 = vmatmul.mubr.bf16.gmra.mxu1 %v4818_v32  ;;  %v772_v48 = vor.u32 %v771_v41, %v767_v37  ;;  %v4249_v37 = vld [vmem:[#allocation7 + $0x68] sm:$0xff]   ;;  %v4251_v41 = vld [vmem:[#allocation7 + $0x60] sm:$0xff]  }
  0x92   : > { %1145 = vmatprep.mubr.bf16.mxu0 %v4787_v5  ;;  %3924 = vmatprep.mubr.bf16.mxu1 %v4823_v35  ;;  %v844_v25 = vor.u32 %v843_v8, %v839_v63 }
  0x93   : > { %v4860_v3 = vsel %vm669_vm0, %v772_v48, %v776_v49  ;;  %3953 = vmatpush3.bf16.msra.mxu0 %v4241_v0  ;;  %3608 = vmatprep.subr.bf16.mxu1 %v4249_v37  ;;  %v820_v48 = vor.u32 %v819_v29, %v815_v22  ;;  %v834_v49 = vshll.u32 %v4884_v34, 16  ;;  %v846_v0 = vshll.u32 %v4898_v54, 16  ;;  %v4260_v22 = vld [vmem:[#allocation7 + $0x50] sm:$0xff]  }
  0x94   : > { %3609 = vmatpush3.bf16.msra.mxu1 %v4250_v39  ;;  %v855_v37 = vrot.slane %v853_v11, 1  ;;  %v4927_v39 = vld [vmem:[%s4723_s17 + $0x8] ss:$0 sps:$4 sm:$0xff]  }
  0x95   : > { %3610 = vmatprep.subr.bf16.mxu1 %v4251_v41  ;;  %v4913_v7 = vsel %vm669_vm0, %v820_v48, %v824_v40  ;;  %v848_v15 = vrot.slane %v846_v0, 1  ;;  %v4941_v48 = vld [vmem:[%s4723_s17 + $0xc] sm:$0xff]   ;;  %v4267_v0 = vld [vmem:[#allocation7 + $0x8] sm:$0xff]  }
  0x96   : > { %v877_v63 = vshll.u32 %v4941_v48, 16  ;;  %v875_v11 = vshrl.u32 %v4941_v48, 16 }
  0x97   : > { %v4935_v41 = vsel %vm669_vm0, %v844_v25, %v848_v15  ;;  %v4270_v15 = vld [vmem:[#allocation7 + $0x98] sm:$0xff]  }
  0x98   : > { %3611 = vmatpush3.bf16.msra.mxu1 %v4252_v46  ;;  %v870_v46 = vshll.u32 %v4927_v39, 16 }
  0x99   : > { %1146 = vmatmul.mubr.bf16.gmra.mxu0 %v4766_v53  ;;  %v803_v53 = vshrl.u32 %v4849_v59, 16  ;;  %3925 = vmatmul.mubr.bf16.gmra.mxu1 %v4856_v62 }
  0x9a   : > { %1153 = vmatprep.mubr.bf16.mxu0 %v4802_v17  ;;  %3928 = vmatprep.mubr.bf16.mxu1 %v4860_v3 }
  0x9b   : > { %v808_v42 = vor.u32 %v807_v16, %v803_v53  ;;  %v836_v53 = vrot.slane %v834_v49, 1  ;;  %3612 = vmatprep.subr.bf16.mxu1 %v4257_v10  ;;  %v851_v16 = vshrl.u32 %v4909_v6, 16  ;;  %v4266_v49 = vld [vmem:[#allocation7 + $0x48] sm:$0xff]   ;;  %v872_v10 = vrot.slane %v870_v46, 1  ;;  %v4274_v46 = vld [vmem:[#allocation7 + $0x1f8] sm:$0xff]  }
  0x9c   : > { %3613 = vmatpush3.bf16.msra.mxu1 %v4259_v19 }
  0x9d   : > { %3614 = vmatprep.subr.bf16.mxu1 %v4260_v22  ;;  %v4931_v40 = vsel %vm669_vm0, %v832_v14, %v836_v53  ;;  %v856_v61 = vor.u32 %v855_v37, %v851_v16  ;;  %v4268_v53 = vld [vmem:[#allocation7 + $0x40] sm:$0xff]   ;;  %v882_v14 = vshll.u32 %v4945_v56, 16  ;;  %v879_v16 = vrot.slane %v877_v63, 1  ;;  %v4271_v22 = vld [vmem:[#allocation7 + $0x90] sm:$0xff]   ;;  %v4276_v37 = vld [vmem:[#allocation7 + $0x238] sm:$0xff]  }
  0x9e   : > { %v4287_v63 = vld [vmem:[#allocation7 + $0x1d0] sm:$0xff]  }
  0xa0   : > { %3615 = vmatpush3.bf16.msra.mxu1 %v4261_v30  ;;  %v884_v30 = vrot.slane %v882_v14, 1 }
  0xa1   : > { %1154 = vmatmul.mubr.bf16.gmra.mxu0 %v4787_v5  ;;  %v812_v5 = vrot.slane %v810_v13, 1  ;;  %3929 = vmatmul.mubr.bf16.gmra.mxu1 %v4877_v28  ;;  %v4258_v13 = vld [vmem:[#allocation7 + $0xa0] sm:$0xff]  }
  0xa2   : > { %1161 = vmatprep.mubr.bf16.mxu0 %v4818_v32  ;;  %3932 = vmatprep.mubr.bf16.mxu1 %v4888_v38 }
  0xa3   : > { %v4904_v57 = vsel %vm669_vm0, %v808_v42, %v812_v5  ;;  %3954 = vmatprep.subr.bf16.mxu0 %v4258_v13  ;;  %v4924_v5 = vld [vmem:[%s4723_s17] sm:$0xff]   ;;  %3616 = vmatprep.subr.bf16.mxu1 %v4266_v49 }
  0xa4   : > { %3955 = vmatpush3.bf16.msra.mxu0 %v4258_v13  ;;  %v863_v42 = vshrl.u32 %v4924_v5, 16  ;;  %v865_v45 = vshll.u32 %v4924_v5, 16  ;;  %3617 = vmatpush3.bf16.msra.mxu1 %v4267_v0  ;;  %v4269_v13 = vld [vmem:[#allocation7] sm:$0xff]   ;;  %v4281_v49 = vld [vmem:[#allocation7 + $0x230] sm:$0xff]  }
  0xa5   : > { %3618 = vmatprep.subr.bf16.mxu1 %v4268_v53  ;;  %3956 = vmatprep.subr.bf16.mxu0 %v4270_v15  ;;  %v4288_v0 = vld [vmem:[#allocation7 + $0x190] sm:$0xff]   ;;  %v4294_v53 = vld [vmem:[#allocation7 + $0x1c0] sm:$0xff]  }
  0xa6   : > { %v867_v55 = vrot.slane %v865_v45, 1 }
  0xa8   : > { %v868_v8 = vor.u32 %v867_v55, %v863_v42  ;;  %3619 = vmatpush3.bf16.msra.mxu1 %v4269_v13  ;;  %3957 = vmatpush3.bf16.msra.mxu0 %v4270_v15  ;;  %v4273_v42 = vld [vmem:[#allocation7 + $0x80] sm:$0xff]   ;;  %v4284_v55 = vld [vmem:[#allocation7 + $0x1d8] sm:$0xff]  }
  0xa9   : > { %1162 = vmatmul.mubr.bf16.gmra.mxu0 %v4802_v17  ;;  %v4916_v17 = vld [vmem:[%s4715_s24 + $0xbc] ss:$0 sps:$4 sm:$0xff]   ;;  %3933 = vmatmul.mubr.bf16.gmra.mxu1 %v4904_v57  ;;  %v4306_v13 = vld [vmem:[%s4715_s24 + $0xc] sm:$0xff]   ;;  %v4307_v15 = vld [vmem:[%s4715_s24 + $0x14] ss:$0 sps:$4 sm:$0xff]  }
  0xaa   : > { %1169 = vmatprep.mubr.bf16.mxu0 %v4823_v35  ;;  %3936 = vmatprep.mubr.bf16.mxu1 %v4913_v7  ;;  %v858_v29 = vshll.u32 %v4916_v17, 16  ;;  %v4957_v25 = vsel %vm669_vm0, %v868_v8, %v872_v10  ;;  %v4290_v8 = vld [vmem:[#allocation7 + $0x1c8] sm:$0xff]   ;;  %v1889_v14 = vrot.slane %v4306_v13, 1 }
  0xab   : > { %3958 = vmatprep.subr.bf16.mxu0 %v4271_v22  ;;  %3996 = vmatprep.subr.bf16.mxu1 %v4276_v37  ;;  %v4291_v10 = vld [vmem:[#allocation7 + $0x188] sm:$0xff]  }
  0xac   : > { %3959 = vmatpush3.bf16.msra.mxu0 %v4271_v22 }
  0xb1   : > { %1170 = vmatmul.mubr.bf16.gmra.mxu0 %v4818_v32  ;;  %3937 = vmatmul.mubr.bf16.gmra.mxu1 %v4931_v40  ;;  %v860_v32 = vrot.slane %v858_v29, 1  ;;  %v4272_v29 = vld [vmem:[#allocation7 + $0x88] sm:$0xff]  }
  0xb2   : > { %1177 = vmatprep.mubr.bf16.mxu0 %v4856_v62  ;;  %3940 = vmatprep.mubr.bf16.mxu1 %v4935_v41 }
  0xb3   : > { %v4953_v19 = vsel %vm669_vm0, %v856_v61, %v860_v32  ;;  %3960 = vmatprep.subr.bf16.mxu0 %v4272_v29  ;;  %v4289_v32 = vld [vmem:[#allocation7 + $0x220] sm:$0xff]   ;;  %v4285_v61 = vld [vmem:[#allocation7 + $0x198] sm:$0xff]  }
  0xb4   : > { %3961 = vmatpush3.bf16.msra.mxu0 %v4272_v29 }
  0xb5   : > { %3962 = vmatprep.subr.bf16.mxu0 %v4273_v42 }
  0xb8   : > { %3963 = vmatpush3.bf16.msra.mxu0 %v4273_v42  ;;  %v4311_v42 = vld [vmem:[%s4715_s24 + $0x8] ss:$0 sps:$4 sm:$0xff]  }
  0xb9   : > { %1178 = vmatmul.mubr.bf16.gmra.mxu0 %v4823_v35  ;;  %3941 = vmatmul.mubr.bf16.gmra.mxu1 %v4953_v19  ;;  %v880_v35 = vor.u32 %v879_v16, %v875_v11  ;;  %v4295_v11 = vld [vmem:[#allocation7 + $0x180] sm:$0xff]   ;;  %v4308_v16 = vld [vmem:[%s4715_s24 + $0x18] sm:$0xff]  }
  0xba   : > { %1185 = vmatprep.mubr.bf16.mxu0 %v4860_v3  ;;  %3944 = vmatprep.mubr.bf16.mxu1 %v4957_v25  ;;  %v1892_v22 = vrot.slane %v4308_v16, 1  ;;  %v1907_v16 = vrot.slane %v4792_v9, 1 }
  0xbb   : > { %v885_v45 = vsel %vm669_vm0, %v880_v35, %v884_v30  ;;  %3740 = vmatprep.subr.bf16.mxu0 %v4274_v46  ;;  %v4310_v30 = vld [vmem:[%s4715_s24] sm:$0xff]  }
  0xc1   : > { %1186 = vmatmul.mubr.bf16.gmra.mxu0 %v4856_v62  ;;  %3945 = vmatmul.mubr.bf16.gmra.mxu1 %v885_v45  ;;  %v4286_v62 = vld [vmem:[#allocation7 + $0x228] sm:$0xff]   ;;  %v1887_v45 = vrot.slane %v4311_v42, 1 }
  0xc2   : > { %1193 = vmatprep.mubr.bf16.mxu0 %v4877_v28  ;;  %1595 = vmatprep.mubr.bf16.mxu1 %v4738_v23 }
  0xc9   : > { %1194 = vmatmul.mubr.bf16.gmra.mxu0 %v4860_v3  ;;  %1596 = vmatmul.mubr.bf16.vlgmr.msra.gmra.mxu1 %v4748_v31  ;;  %v4292_v3 = vld [vmem:[#allocation7 + $0x218] sm:$0xff]   ;;  %v4293_v31 = vld [vmem:[#allocation7 + $0x210] sm:$0xff]  }
  0xca   : > { %1201 = vmatprep.mubr.bf16.mxu0 %v4888_v38  ;;  %1603 = vmatprep.mubr.bf16.mxu1 %v4742_v26 }
  0xcb   : > { %3997 = vmatpush3.bf16.msra.mxu1 %v4276_v37  ;;  %v1886_v37 = vrot.slane %v4310_v30, 1  ;;  %v1911_v30 = vrot.slane %v4826_v36, 1 }
  0xcc   : > { %3998 = vmatprep.subr.bf16.mxu1 %v4281_v49 }
  0xcf   : > { %3999 = vmatpush3.bf16.msra.mxu1 %v4281_v49  ;;  %v4312_v49 = vld [vmem:[%s4715_s24 + $0x24] sm:$0xff]  }
  0xd0   : > { %4000 = vmatprep.subr.bf16.mxu1 %v4286_v62 }
  0xd1   : > { %1202 = vmatmul.mubr.bf16.gmra.mxu0 %v4877_v28  ;;  %1604 = vmatmul.mubr.bf16.gmra.mxu1 %v4738_v23  ;;  %v4296_v28 = vld [vmem:[#allocation7 + $0x208] sm:$0xff]   ;;  %v4297_v23 = vld [vmem:[#allocation7 + $0x200] sm:$0xff]  }
  0xd2   : > { %1209 = vmatprep.mubr.bf16.mxu0 %v4904_v57  ;;  %1611 = vmatprep.mubr.bf16.mxu1 %v4756_v43 }
  0xd3   : > { %4001 = vmatpush3.bf16.msra.mxu1 %v4286_v62  ;;  %v1895_v62 = vrot.slane %v4312_v49, 1 }
  0xd4   : > { %4002 = vmatprep.subr.bf16.mxu1 %v4289_v32 }
  0xd7   : > { %4003 = vmatpush3.bf16.msra.mxu1 %v4289_v32  ;;  %v4313_v32 = vld [vmem:[%s4715_s24 + $0x2c] ss:$0 sps:$4 sm:$0xff]  }
  0xd8   : > { %4004 = vmatprep.subr.bf16.mxu1 %v4292_v3 }
  0xd9   : > { %1210 = vmatmul.mubr.bf16.gmra.mxu0 %v4888_v38  ;;  %1612 = vmatmul.mubr.bf16.gmra.mxu1 %v4742_v26  ;;  %v4275_v38 = vld [vmem:[#allocation7 + $0x1b8] sm:$0xff]  }
  0xda   : > { %1217 = vmatprep.mubr.bf16.mxu0 %v4913_v7  ;;  %1619 = vmatprep.mubr.bf16.mxu1 %v4763_v52 }
  0xdb   : > { %4005 = vmatpush3.bf16.msra.mxu1 %v4292_v3  ;;  %v1896_v3 = vrot.slane %v4313_v32, 1 }
  0xdc   : > { %4006 = vmatprep.subr.bf16.mxu1 %v4293_v31 }
  0xdf   : > { %4007 = vmatpush3.bf16.msra.mxu1 %v4293_v31  ;;  %v1888_v31 = vsel %vm1885_vm1, %v1886_v37, %v1887_v45 }
  0xe0   : > { %4008 = vmatprep.subr.bf16.mxu1 %v4296_v28 }
  0xe1   : > { %1218 = vmatmul.mubr.bf16.gmra.mxu0 %v4904_v57  ;;  %1620 = vmatmul.mubr.bf16.gmra.mxu1 %v4756_v43  ;;  %v4277_v57 = vld [vmem:[#allocation7 + $0x1f0] sm:$0xff]  }
  0xe2   : > { %1225 = vmatprep.mubr.bf16.mxu0 %v4931_v40  ;;  %1627 = vmatprep.mubr.bf16.mxu1 %v4777_v1 }
  0xe3   : > { %4009 = vmatpush3.bf16.msra.mxu1 %v4296_v28  ;;  %v1898_v28 = vrot.slane %v4763_v52, 1 }
  0xe4   : > { %4010 = vmatprep.subr.bf16.mxu1 %v4297_v23 }
  0xe7   : > { %4011 = vmatpush3.bf16.msra.mxu1 %v4297_v23  ;;  %v1899_v23 = vrot.slane %v4770_v58, 1 }
  0xe9   : > { %1226 = vmatmul.mubr.bf16.gmra.mxu0 %v4913_v7  ;;  %1628 = vmatmul.mubr.bf16.gmra.mxu1 %v4763_v52  ;;  %v4278_v7 = vld [vmem:[#allocation7 + $0x1b0] sm:$0xff]  }
  0xea   : > { %1233 = vmatprep.mubr.bf16.mxu0 %v4935_v41  ;;  %1635 = vmatprep.mubr.bf16.mxu1 %v4784_v4 }
  0xf1   : > { %1234 = vmatmul.mubr.bf16.gmra.mxu0 %v4931_v40  ;;  %1636 = vmatmul.mubr.bf16.gmra.mxu1 %v4777_v1  ;;  %v4279_v40 = vld [vmem:[#allocation7 + $0x1e8] sm:$0xff]  }
  0xf2   : > { %1241 = vmatprep.mubr.bf16.mxu0 %v4953_v19  ;;  %1643 = vmatprep.mubr.bf16.mxu1 %v4792_v9 }
  0xf9   : > { %1242 = vmatmul.mubr.bf16.gmra.mxu0 %v4935_v41  ;;  %1644 = vmatmul.mubr.bf16.gmra.mxu1 %v4784_v4  ;;  %v4282_v41 = vld [vmem:[#allocation7 + $0x1e0] sm:$0xff]  }
  0xfa   : > { %1249 = vmatprep.mubr.bf16.mxu0 %v4957_v25  ;;  %1651 = vmatprep.mubr.bf16.mxu1 %v4806_v21  ;;  %v4309_v25 = vld [vmem:[%s4715_s24 + $0x20] ss:$0 sps:$4 sm:$0xff]   ;;  %s4426_s24 = sshll.u32 %s4522_s7, 4  ;;  %s4427_s24 = int_to_ptr.vmem [resolvable:$false] %s4426_s24 }
  0xfb   : > { %v1893_v29 = vrot.slane %v4309_v25, 1  ;;  %s4428_s26 = scalar_lea.vmem %s4427_s24, 4096  ;;  %p4429_p7 = scmp.lt.s32.totalorder %s5580_s23, %s4427_s24 }
  0xfc   : > { %p4430_p2 = scmp.lt.s32.totalorder %s4428_s26, %s4422_s5 }
  0xfd   : > { %v1894_v46 = vsel %vm1885_vm1, %v1892_v22, %v1893_v29  ;;  %v1908_v22 = vrot.slane %v4810_v24, 1 }
  0xfe   : > { %p4431_p9 = por %p4430_p2, %p4429_p7 }
 0x100   : > { %p4432_p12 = pnand %p4431_p9, %p4425_p8 }
 0x101   : > { %1250 = vmatmul.mubr.bf16.gmra.mxu0 %v4953_v19  ;;  %1652 = vmatmul.mubr.bf16.gmra.mxu1 %v4792_v9  ;;  %v1890_v19 = vrot.slane %v4307_v15, 1 }
 0x102   : > { %3964 = vmatprep.mubr.bf16.mxu0 %v4742_v26  ;;  %1659 = vmatprep.mubr.bf16.mxu1 %v4814_v27  ;;  %v4280_v26 = vld [vmem:[#allocation7 + $0x1a8] sm:$0xff]  }
 0x103   : > { %v1891_v35 = vsel %vm1885_vm1, %v1889_v14, %v1890_v19 }
 0x109   : > { %3965 = vmatmul.mubr.bf16.vlgmr.msra.gmra.mxu0 %v4756_v43  ;;  %1660 = vmatmul.mubr.bf16.gmra.mxu1 %v4806_v21  ;;  %v4283_v43 = vld [vmem:[#allocation7 + $0x1a0] sm:$0xff]  }
 0x10a   : > { %3741 = vmatpush3.bf16.msra.mxu0 %v4275_v38  ;;  %3968 = vmatprep.mubr.bf16.mxu0 %v4763_v52  ;;  %v1902_v52 = vrot.slane %v4780_v2, 1 }
 0x10b   : > { %3742 = vmatprep.subr.bf16.mxu0 %v4277_v57  ;;  %1667 = vmatprep.mubr.bf16.mxu1 %v4839_v47  ;;  %v1897_v57 = vsel %vm1885_vm1, %v1895_v62, %v1896_v3  ;;  %v5068_v62 = vsel %vm1885_vm1, %v1907_v16, %v1908_v22 }
 0x10e   : > { %3743 = vmatpush3.bf16.msra.mxu0 %v4278_v7  ;;  %v5042_v7 = vsel %vm1885_vm1, %v1898_v28, %v1899_v23  ;;  %v1914_v28 = vrot.slane %v4835_v44, 1 }
 0x10f   : > { %3744 = vmatprep.subr.bf16.mxu0 %v4279_v40 }
 0x111   : > { %3969 = vmatmul.mubr.bf16.gmra.mxu0 %v4777_v1  ;;  %1668 = vmatmul.mubr.bf16.gmra.mxu1 %v4814_v27 }
 0x112   : > { %3972 = vmatprep.mubr.bf16.mxu0 %v4784_v4  ;;  %3745 = vmatpush3.bf16.msra.mxu0 %v4280_v26 }
 0x113   : > { %3746 = vmatprep.subr.bf16.mxu0 %v4282_v41  ;;  %1675 = vmatprep.mubr.bf16.mxu1 %v4849_v59 }
 0x116   : > { %3747 = vmatpush3.bf16.msra.mxu0 %v4283_v43 }
 0x117   : > { %3748 = vmatprep.subr.bf16.mxu0 %v4284_v55  ;;  %v1901_v55 = vrot.slane %v4777_v1, 1 }
 0x119   : > { %3973 = vmatmul.mubr.bf16.gmra.mxu0 %v4792_v9  ;;  %1676 = vmatmul.mubr.bf16.gmra.mxu1 %v4839_v47  ;;  %v5052_v13 = vsel %vm1885_vm1, %v1901_v55, %v1902_v52 }
 0x11a   : > { %3976 = vmatprep.mubr.bf16.mxu0 %v4806_v21  ;;  %3749 = vmatpush3.bf16.msra.mxu0 %v4285_v61  ;;  %v1904_v61 = vrot.slane %v4784_v4, 1 }
 0x11b   : > { %3750 = vmatprep.subr.bf16.mxu0 %v4287_v63  ;;  %1683 = vmatprep.mubr.bf16.mxu1 %v4868_v18  ;;  %v1905_v63 = vrot.slane %v4797_v12, 1 }
 0x11d   : > { %v5055_v1 = vsel %vm1885_vm1, %v1904_v61, %v1905_v63 }
 0x11e   : > { %3751 = vmatpush3.bf16.msra.mxu0 %v4288_v0 }
 0x11f   : > { %3752 = vmatprep.subr.bf16.mxu0 %v4290_v8 }
 0x121   : > { %3977 = vmatmul.mubr.bf16.gmra.mxu0 %v4814_v27  ;;  %1684 = vmatmul.mubr.bf16.gmra.mxu1 %v4849_v59 }
 0x122   : > { %3980 = vmatprep.mubr.bf16.mxu0 %v4839_v47  ;;  %3753 = vmatpush3.bf16.msra.mxu0 %v4291_v10 }
 0x123   : > { %3754 = vmatprep.subr.bf16.mxu0 %v4294_v53  ;;  %1691 = vmatprep.mubr.bf16.mxu1 %v4881_v33 }
 0x126   : > { %3755 = vmatpush3.bf16.msra.mxu0 %v4295_v11 }
 0x129   : > { %3981 = vmatmul.mubr.bf16.gmra.mxu0 %v4849_v59  ;;  %1692 = vmatmul.mubr.bf16.gmra.mxu1 %v4868_v18 }
 0x12a   : > { %3984 = vmatprep.mubr.bf16.mxu0 %v4868_v18  ;;  %1699 = vmatprep.mubr.bf16.mxu1 %v4895_v50 }
 0x131   : > { %3985 = vmatmul.mubr.bf16.gmra.mxu0 %v4881_v33  ;;  %1700 = vmatmul.mubr.bf16.gmra.mxu1 %v4881_v33 }
 0x132   : > { %3988 = vmatprep.mubr.bf16.mxu0 %v4895_v50  ;;  %1707 = vmatprep.mubr.bf16.mxu1 %v4909_v6 }
 0x139   : > { %3989 = vmatmul.mubr.bf16.gmra.mxu0 %v4909_v6  ;;  %1708 = vmatmul.mubr.bf16.gmra.mxu1 %v4895_v50 }
 0x13a   : > { %3992 = vmatprep.mubr.bf16.mxu0 %v4924_v5  ;;  %1715 = vmatprep.mubr.bf16.mxu1 %v4924_v5 }
 0x141   : > { %3993 = vmatmul.mubr.bf16.gmra.mxu0 %v4941_v48  ;;  %1716 = vmatmul.mubr.bf16.gmra.mxu1 %v4909_v6 }
 0x142   : > { %2183 = vmatprep.mubr.bf16.mxu0 %v1891_v35  ;;  %4012 = vmatprep.mubr.bf16.mxu1 %v1894_v46 }
 0x149   : > { %v3484_v38 = vpop.f32.mrf.mxu0  ;;  %2184 = vmatmul.mubr.bf16.vlgmr.msra.gmra.mxu0 %v1888_v31  ;;  %v3918_v26 = vpop.f32.mrf.mxu1  ;;  %4013 = vmatmul.mubr.bf16.vlgmr.msra.gmra.mxu1 %v1897_v57 }
 0x14a   : > { %2191 = vmatprep.mubr.bf16.mxu0 %v1894_v46  ;;  %4016 = vmatprep.mubr.bf16.mxu1 %v5042_v7 }
 0x14b   : > { %v3485_v40 = vpop.f32.mrf.mxu0  ;;  %v1292_v58 = vpop.f32.mrf.mxu1 }
 0x14c   : > { %v3486_v41 = vadd.f32 %v3485_v40, %v3484_v38  ;;  %v1916_v40 = vrot.slane %v4839_v47, 1 }
 0x14d   : > { %v3487_v43 = vpop.f32.mrf.mxu0  ;;  %v3919_v10 = vpop.f32.mrf.mxu1 }
 0x14e   : > { %v5049_v0 = vadd.f32 %v3486_v41, %v1292_v58 }
 0x14f   : > { %v3488_v8 = vpop.f32.mrf.mxu0  ;;  %v1295_v14 = vpop.f32.mrf.mxu1 }
 0x150   : > { %v3489_v53 = vadd.f32 %v3488_v8, %v3487_v43 }
 0x151   : > { %v3490_v11 = vpop.f32.mrf.mxu0  ;;  %2192 = vmatmul.mubr.bf16.gmra.mxu0 %v1891_v35  ;;  %v3922_v15 = vpop.f32.mrf.mxu1  ;;  %4017 = vmatmul.mubr.bf16.gmra.mxu1 %v5052_v13  ;;  %v1910_v35 = vrot.slane %v4806_v21, 1 }
 0x152   : > { %2199 = vmatprep.mubr.bf16.mxu0 %v1897_v57  ;;  %v5057_v2 = vadd.f32 %v3489_v53, %v1295_v14  ;;  %4020 = vmatprep.mubr.bf16.mxu1 %v5055_v1  ;;  %v1922_v14 = vrot.slane %v4868_v18, 1 }
 0x153   : > { %v3491_v4 = vpop.f32.mrf.mxu0  ;;  %v1308_v29 = vpop.f32.mrf.mxu1  ;;  %v5074_v24 = vsel %vm1885_vm1, %v1910_v35, %v1911_v30 }
 0x154   : > { %v3492_v12 = vadd.f32 %v3491_v4, %v3490_v11  ;;  %v1923_v4 = vrot.slane %v4871_v20, 1 }
 0x155   : > { %v3493_v19 = vpop.f32.mrf.mxu0  ;;  %v3923_v42 = vpop.f32.mrf.mxu1 }
 0x156   : > { %v5063_v25 = vadd.f32 %v3918_v26, %v3492_v12  ;;  %v1917_v26 = vrot.slane %v4843_v51, 1  ;;  %v5121_v18 = vsel %vm1885_vm1, %v1922_v14, %v1923_v4 }
 0x157   : > { %v3494_v37 = vpop.f32.mrf.mxu0  ;;  %v1311_v9 = vpop.f32.mrf.mxu1 }
 0x158   : > { %v3495_v45 = vadd.f32 %v3494_v37, %v3493_v19  ;;  %v5095_v44 = vsel %vm1885_vm1, %v1916_v40, %v1917_v26  ;;  %v1926_v37 = vrot.slane %v4884_v34, 1 }
 0x159   : > { %v3496_v49 = vpop.f32.mrf.mxu0  ;;  %2200 = vmatmul.mubr.bf16.gmra.mxu0 %v1894_v46  ;;  %v5076_v21 = vpop.f32.mrf.mxu1  ;;  %4021 = vmatmul.mubr.bf16.gmra.mxu1 %v5068_v62  ;;  %v1913_v46 = vrot.slane %v4814_v27, 1 }
 0x15a   : > { %v5070_v32 = vadd.f32 %v3919_v10, %v3495_v45  ;;  %2207 = vmatprep.mubr.bf16.mxu0 %v5042_v7  ;;  %4024 = vmatprep.mubr.bf16.mxu1 %v5074_v24  ;;  %v1920_v10 = vrot.slane %v4852_v60, 1 }
 0x15b   : > { %v3497_v3 = vpop.f32.mrf.mxu0  ;;  %v1324_v38 = vpop.f32.mrf.mxu1  ;;  %v5089_v58 = vsel %vm1885_vm1, %v1913_v46, %v1914_v28 }
 0x15c   : > { %v3498_v36 = vadd.f32 %v3497_v3, %v3496_v49  ;;  %v1928_v49 = vrot.slane %v4895_v50, 1 }
 0x15d   : > { %v3499_v31 = vpop.f32.mrf.mxu0  ;;  %v5086_v43 = vpop.f32.mrf.mxu1 }
 0x15e   : > { %v5082_v23 = vadd.f32 %v3498_v36, %v1308_v29 }
 0x15f   : > { %v3500_v41 = vpop.f32.mrf.mxu0  ;;  %v1327_v27 = vpop.f32.mrf.mxu1 }
 0x160   : > { %v3501_v55 = vadd.f32 %v3500_v41, %v3499_v31  ;;  %v1932_v41 = vrot.slane %v4916_v17, 1 }
 0x161   : > { %v3502_v52 = vpop.f32.mrf.mxu0  ;;  %2208 = vmatmul.mubr.bf16.gmra.mxu0 %v1897_v57  ;;  %v5097_v63 = vpop.f32.mrf.mxu1  ;;  %4025 = vmatmul.mubr.bf16.gmra.mxu1 %v5089_v58  ;;  %v1919_v57 = vrot.slane %v4849_v59, 1 }
 0x162   : > { %v5091_v61 = vadd.f32 %v3501_v55, %v1311_v9  ;;  %2215 = vmatprep.mubr.bf16.mxu0 %v5052_v13  ;;  %4028 = vmatprep.mubr.bf16.mxu1 %v5095_v44  ;;  %v1929_v9 = vrot.slane %v4898_v54, 1 }
 0x163   : > { %v3503_v47 = vpop.f32.mrf.mxu0  ;;  %v5105_v11 = vpop.f32.mrf.mxu1  ;;  %v5113_v29 = vsel %vm1885_vm1, %v1919_v57, %v1920_v10 }
 0x164   : > { %v3504_v51 = vadd.f32 %v3503_v47, %v3502_v52  ;;  %v5147_v50 = vsel %vm1885_vm1, %v1928_v49, %v1929_v9  ;;  %v1935_v47 = vrot.slane %v4927_v39, 1 }
 0x165   : > { %v3505_v8 = vpop.f32.mrf.mxu0  ;;  %v5109_v19 = vpop.f32.mrf.mxu1 }
 0x166   : > { %v5103_v53 = vadd.f32 %v3922_v15, %v3504_v51 }
 0x167   : > { %v3506_v12 = vpop.f32.mrf.mxu0  ;;  %v5117_v60 = vpop.f32.mrf.mxu1 }
 0x168   : > { %v3507_v16 = vadd.f32 %v3506_v12, %v3505_v8  ;;  %v1937_v12 = vrot.slane %v4941_v48, 1 }
 0x169   : > { %v3508_v22 = vpop.f32.mrf.mxu0  ;;  %2216 = vmatmul.mubr.bf16.gmra.mxu0 %v5042_v7  ;;  %v5123_v15 = vpop.f32.mrf.mxu1  ;;  %4029 = vmatmul.mubr.bf16.gmra.mxu1 %v5113_v29  ;;  %v1925_v7 = vrot.slane %v4881_v33, 1 }
 0x16a   : > { %v5115_v59 = vadd.f32 %v3923_v42, %v3507_v16  ;;  %2223 = vmatprep.mubr.bf16.mxu0 %v5055_v1  ;;  %4032 = vmatprep.mubr.bf16.mxu1 %v5121_v18 }
 0x16b   : > { %v3509_v20 = vpop.f32.mrf.mxu0  ;;  %v5131_v45 = vpop.f32.mrf.mxu1  ;;  %v5139_v28 = vsel %vm1885_vm1, %v1925_v7, %v1926_v37 }
 0x16c   : > { %v3510_v35 = vadd.f32 %v3509_v20, %v3508_v22 }
 0x16d   : > { %v3511_v30 = vpop.f32.mrf.mxu0  ;;  %v5135_v36 = vpop.f32.mrf.mxu1 }
 0x16e   : > { %v5129_v42 = vadd.f32 %v3510_v35, %v1324_v38 }
 0x16f   : > { %v3512_v3 = vpop.f32.mrf.mxu0  ;;  %v5143_v34 = vpop.f32.mrf.mxu1 }
 0x170   : > { %v3513_v31 = vadd.f32 %v3512_v3, %v3511_v30 }
 0x171   : > { %v3514_v46 = vpop.f32.mrf.mxu0  ;;  %2224 = vmatmul.mubr.bf16.gmra.mxu0 %v5052_v13  ;;  %v5149_v38 = vpop.f32.mrf.mxu1  ;;  %4033 = vmatmul.mubr.bf16.gmra.mxu1 %v5139_v28  ;;  %v1931_v13 = vrot.slane %v4909_v6, 1 }
 0x172   : > { %v5141_v33 = vadd.f32 %v3513_v31, %v1327_v27  ;;  %2231 = vmatprep.mubr.bf16.mxu0 %v5068_v62  ;;  %4036 = vmatprep.mubr.bf16.mxu1 %v5147_v50  ;;  %v1934_v27 = vrot.slane %v4924_v5, 1 }
 0x173   : > { %v3515_v54 = vpop.f32.mrf.mxu0  ;;  %v5158_v52 = vpop.f32.mrf.mxu1  ;;  %v5166_v6 = vsel %vm1885_vm1, %v1931_v13, %v1932_v41 }
 0x174   : > { %v3516_v40 = vadd.f32 %v3515_v54, %v3514_v46  ;;  %v5175_v5 = vsel %vm1885_vm1, %v1934_v27, %v1935_v47  ;;  %v4298_v54 = vld [vmem:[#allocation8 + $0x38] sm:$0xff]   ;;  %v4299_v27 = vld [vmem:[#allocation8 + $0x30] sm:$0xff]  }
 0x175   : > { %v3517_v26 = vpop.f32.mrf.mxu0  ;;  %v5162_v8 = vpop.f32.mrf.mxu1  ;;  %4044 = vmatprep.subr.bf16.mxu1 %v4298_v54 }
 0x176   : > { %v5156_v55 = vadd.f32 %v5076_v21, %v3516_v40  ;;  %4045 = vmatpush3.bf16.msra.mxu1 %v4298_v54 }
 0x177   : > { %v3518_v51 = vpop.f32.mrf.mxu0  ;;  %v5171_v21 = vpop.f32.mrf.mxu1  ;;  %4046 = vmatprep.subr.bf16.mxu1 %v4299_v27 }
 0x178   : > { %v3519_v57 = vadd.f32 %v3518_v51, %v3517_v26 }
 0x179   : > { %v3520_v10 = vpop.f32.mrf.mxu0  ;;  %2232 = vmatmul.mubr.bf16.gmra.mxu0 %v5055_v1  ;;  %v5177_v14 = vpop.f32.mrf.mxu1  ;;  %4037 = vmatmul.mubr.bf16.gmra.mxu1 %v5166_v6 }
 0x17a   : > { %v5169_v17 = vadd.f32 %v5086_v43, %v3519_v57  ;;  %2239 = vmatprep.mubr.bf16.mxu0 %v5074_v24  ;;  %4040 = vmatprep.mubr.bf16.mxu1 %v5175_v5  ;;  %v1938_v43 = vrot.slane %v4945_v56, 1 }
 0x17b   : > { %v3521_v39 = vpop.f32.mrf.mxu0  ;;  %v5186_v22 = vpop.f32.mrf.mxu1  ;;  %4047 = vmatpush3.bf16.msra.mxu1 %v4299_v27 }
 0x17c   : > { %v3522_v4 = vadd.f32 %v3521_v39, %v3520_v10  ;;  %v1939_v37 = vsel %vm1885_vm1, %v1937_v12, %v1938_v43 }
 0x17d   : > { %v3523_v1 = vpop.f32.mrf.mxu0  ;;  %v5188_v35 = vpop.f32.mrf.mxu1 }
 0x17e   : > { %v5184_v16 = vadd.f32 %v3522_v4, %v5105_v11 }
 0x17f   : > { %v3524_v20 = vpop.f32.mrf.mxu0  ;;  %v5195_v48 = vpop.f32.mrf.mxu1 }
 0x180   : > { %v3525_v30 = vadd.f32 %v3524_v20, %v3523_v1 }
 0x181   : > { %v3526_v7 = vpop.f32.mrf.mxu0  ;;  %2240 = vmatmul.mubr.bf16.gmra.mxu0 %v5068_v62  ;;  %v5198_v11 = vpop.f32.mrf.mxu1  ;;  %4041 = vmatmul.mubr.bf16.gmra.mxu1 %v1939_v37  ;;  %v4301_v37 = vld [vmem:[#allocation8 + $0x20] sm:$0xff]  }
 0x182   : > { %v5193_v49 = vadd.f32 %v3525_v30, %v5117_v60  ;;  %2247 = vmatprep.mubr.bf16.mxu0 %v5089_v58 }
 0x183   : > { %v3527_v56 = vpop.f32.mrf.mxu0  ;;  %v5203_v46 = vpop.f32.mrf.mxu1 }
 0x184   : > { %v3528_v9 = vadd.f32 %v3527_v56, %v3526_v7 }
 0x185   : > { %v3529_v3 = vpop.f32.mrf.mxu0  ;;  %v5205_v40 = vpop.f32.mrf.mxu1 }
 0x186   : > { %v5201_v31 = vadd.f32 %v5097_v63, %v3528_v9 }
 0x187   : > { %v3530_v62 = vpop.f32.mrf.mxu0  ;;  %v5211_v41 = vpop.f32.mrf.mxu1 }
 0x188   : > { %v3531_v60 = vadd.f32 %v3530_v62, %v3529_v3 }
 0x189   : > { %v3532_v26 = vpop.f32.mrf.mxu0  ;;  %2248 = vmatmul.mubr.bf16.gmra.mxu0 %v5074_v24  ;;  %v3620_v47 = vpop.f32.mrf.mxu1 }
 0x18a   : > { %v5209_v13 = vadd.f32 %v5109_v19, %v3531_v60  ;;  %2255 = vmatprep.mubr.bf16.mxu0 %v5095_v44  ;;  %v4300_v19 = vld [vmem:[#allocation8 + $0x28] sm:$0xff]  }
 0x18b   : > { %v3533_v63 = vpop.f32.mrf.mxu0  ;;  %v3621_v39 = vpop.f32.mrf.mxu1  ;;  %4048 = vmatprep.subr.bf16.mxu1 %v4300_v19 }
 0x18c   : > { %v3534_v51 = vadd.f32 %v3533_v63, %v3532_v26  ;;  %v3622_v24 = vadd.f32 %v3621_v39, %v3620_v47  ;;  %4049 = vmatpush3.bf16.msra.mxu1 %v4300_v19  ;;  %v4302_v26 = vld [vmem:[#allocation8 + $0x18] sm:$0xff]  }
 0x18d   : > { %v3535_v57 = vpop.f32.mrf.mxu0  ;;  %v3623_v1 = vpop.f32.mrf.mxu1  ;;  %4050 = vmatprep.subr.bf16.mxu1 %v4301_v37 }
 0x18e   : > { %v5215_v10 = vadd.f32 %v3534_v51, %v5131_v45  ;;  %v5221_v20 = vadd.f32 %v3622_v24, %v5049_v0  ;;  %v4303_v24 = vld [vmem:[#allocation8 + $0x10] sm:$0xff]  }
 0x18f   : > { %v3536_v4 = vpop.f32.mrf.mxu0  ;;  %v3624_v30 = vpop.f32.mrf.mxu1 }
 0x190   : > { %v5217_v12 = vadd.f32 %v3536_v4, %v3535_v57  ;;  %v3625_v45 = vadd.f32 %v3624_v30, %v3623_v1  ;;  %4051 = vmatpush3.bf16.msra.mxu1 %v4301_v37 }
 0x191   : > { %v3538_v43 = vpop.f32.mrf.mxu0  ;;  %2256 = vmatmul.mubr.bf16.gmra.mxu0 %v5089_v58  ;;  %v3626_v56 = vpop.f32.mrf.mxu1  ;;  %4052 = vmatprep.subr.bf16.mxu1 %v4302_v26 }
 0x192   : > { %2263 = vmatprep.mubr.bf16.mxu0 %v5113_v29  ;;  %v5225_v62 = vadd.f32 %v3625_v45, %v5057_v2  ;;  %v4304_v45 = vld [vmem:[#allocation8 + $0x8] sm:$0xff]  }
 0x193   : > { %v3539_v7 = vpop.f32.mrf.mxu0  ;;  %v3627_v0 = vpop.f32.mrf.mxu1 }
 0x194   : > { %v3540_v9 = vadd.f32 %v3539_v7, %v3538_v43  ;;  %v3628_v54 = vadd.f32 %v3627_v0, %v3626_v56  ;;  %4053 = vmatpush3.bf16.msra.mxu1 %v4302_v26  ;;  %v4305_v0 = vld [vmem:[#allocation8] sm:$0xff]  }
 0x195   : > { %v3541_v3 = vpop.f32.mrf.mxu0  ;;  %v3629_v63 = vpop.f32.mrf.mxu1  ;;  %4054 = vmatprep.subr.bf16.mxu1 %v4303_v24 }
 0x196   : > { %v5228_v58 = vadd.f32 %v5123_v15, %v3540_v9  ;;  %v5232_v51 = vadd.f32 %v3628_v54, %v5063_v25 }
 0x197   : > { %v3542_v60 = vpop.f32.mrf.mxu0  ;;  %v3630_v57 = vpop.f32.mrf.mxu1 }
 0x198   : > { %v3543_v27 = vadd.f32 %v3542_v60, %v3541_v3  ;;  %v3631_v15 = vadd.f32 %v3630_v57, %v3629_v63  ;;  %4055 = vmatpush3.bf16.msra.mxu1 %v4303_v24 }
 0x199   : > { %v3544_v47 = vpop.f32.mrf.mxu0  ;;  %2264 = vmatmul.mubr.bf16.gmra.mxu0 %v5095_v44  ;;  %v3632_v4 = vpop.f32.mrf.mxu1  ;;  %4056 = vmatprep.subr.bf16.mxu1 %v4304_v45 }
 0x19a   : > { %v5235_v2 = vadd.f32 %v5135_v36, %v3543_v27  ;;  %2271 = vmatprep.mubr.bf16.mxu0 %v5121_v18  ;;  %v5239_v43 = vadd.f32 %v3631_v15, %v5070_v32 }
 0x19b   : > { %v3545_v39 = vpop.f32.mrf.mxu0  ;;  %v3633_v44 = vpop.f32.mrf.mxu1 }
 0x19c   : > { %v3546_v19 = vadd.f32 %v3545_v39, %v3544_v47  ;;  %v3634_v36 = vadd.f32 %v3633_v44, %v3632_v4  ;;  %4057 = vmatpush3.bf16.msra.mxu1 %v4304_v45 }
 0x19d   : > { %v3547_v1 = vpop.f32.mrf.mxu0  ;;  %v3635_v7 = vpop.f32.mrf.mxu1  ;;  %4058 = vmatprep.subr.bf16.mxu1 %v4305_v0 }
 0x19e   : > { %v5242_v25 = vadd.f32 %v3546_v19, %v5158_v52  ;;  %v5248_v9 = vadd.f32 %v3634_v36, %v5082_v23 }
 0x19f   : > { %v3548_v30 = vpop.f32.mrf.mxu0  ;;  %v3636_v32 = vpop.f32.mrf.mxu1 }
 0x1a0   : > { %v5244_v37 = vadd.f32 %v3548_v30, %v3547_v1  ;;  %v3637_v52 = vadd.f32 %v3636_v32, %v3635_v7  ;;  %4059 = vmatpush3.bf16.msra.mxu1 %v4305_v0 }
 0x1a1   : > { %v3550_v56 = vpop.f32.mrf.mxu0  ;;  %2272 = vmatmul.mubr.bf16.gmra.mxu0 %v5113_v29  ;;  %v3638_v54 = vpop.f32.mrf.mxu1 }
 0x1a2   : > { %2279 = vmatprep.mubr.bf16.mxu0 %v5139_v28  ;;  %v5252_v63 = vadd.f32 %v3637_v52, %v5091_v61 }
 0x1a3   : > { %v3551_v3 = vpop.f32.mrf.mxu0  ;;  %v3639_v23 = vpop.f32.mrf.mxu1 }
 0x1a4   : > { %v3552_v60 = vadd.f32 %v3551_v3, %v3550_v56  ;;  %v3640_v27 = vadd.f32 %v3639_v23, %v3638_v54 }
 0x1a5   : > { %v3553_v26 = vpop.f32.mrf.mxu0  ;;  %v3641_v57 = vpop.f32.mrf.mxu1 }
 0x1a6   : > { %v5255_v29 = vadd.f32 %v5149_v38, %v3552_v60  ;;  %v5259_v24 = vadd.f32 %v3640_v27, %v5103_v53 }
 0x1a7   : > { %v3554_v47 = vpop.f32.mrf.mxu0  ;;  %v3642_v61 = vpop.f32.mrf.mxu1 }
 0x1a8   : > { %v3555_v15 = vadd.f32 %v3554_v47, %v3553_v26  ;;  %v3643_v38 = vadd.f32 %v3642_v61, %v3641_v57 }
 0x1a9   : > { %v3556_v39 = vpop.f32.mrf.mxu0  ;;  %2280 = vmatmul.mubr.bf16.gmra.mxu0 %v5121_v18  ;;  %v3644_v1 = vpop.f32.mrf.mxu1 }
 0x1aa   : > { %v5262_v4 = vadd.f32 %v5162_v8, %v3555_v15  ;;  %2287 = vmatprep.mubr.bf16.mxu0 %v5147_v50  ;;  %v5266_v30 = vadd.f32 %v3643_v38, %v5115_v59 }
 0x1ab   : > { %v3557_v19 = vpop.f32.mrf.mxu0  ;;  %v3645_v18 = vpop.f32.mrf.mxu1 }
 0x1ac   : > { %v3558_v44 = vadd.f32 %v3557_v19, %v3556_v39  ;;  %v3646_v53 = vadd.f32 %v3645_v18, %v3644_v1 }
 0x1ad   : > { %v3559_v36 = vpop.f32.mrf.mxu0  ;;  %v3647_v56 = vpop.f32.mrf.mxu1 }
 0x1ae   : > { %v5269_v45 = vadd.f32 %v3558_v44, %v5186_v22  ;;  %v5275_v52 = vadd.f32 %v3646_v53, %v5129_v42 }
 0x1af   : > { %v3560_v7 = vpop.f32.mrf.mxu0  ;;  %v3648_v3 = vpop.f32.mrf.mxu1 }
 0x1b0   : > { %v5271_v8 = vadd.f32 %v3560_v7, %v3559_v36  ;;  %v3649_v59 = vadd.f32 %v3648_v3, %v3647_v56 }
 0x1b1   : > { %v3562_v32 = vpop.f32.mrf.mxu0  ;;  %2288 = vmatmul.mubr.bf16.gmra.mxu0 %v5139_v28  ;;  %v3650_v54 = vpop.f32.mrf.mxu1 }
 0x1b2   : > { %2295 = vmatprep.mubr.bf16.mxu0 %v5166_v6  ;;  %v5279_v26 = vadd.f32 %v3649_v59, %v5141_v33 }
 0x1b3   : > { %v3563_v0 = vpop.f32.mrf.mxu0  ;;  %v3651_v27 = vpop.f32.mrf.mxu1 }
 0x1b4   : > { %v3564_v22 = vadd.f32 %v3563_v0, %v3562_v32  ;;  %v3652_v47 = vadd.f32 %v3651_v27, %v3650_v54 }
 0x1b5   : > { %v3565_v60 = vpop.f32.mrf.mxu0  ;;  %v3653_v57 = vpop.f32.mrf.mxu1 }
 0x1b6   : > { %v5282_v23 = vadd.f32 %v5177_v14, %v3564_v22  ;;  %v5286_v39 = vadd.f32 %v3652_v47, %v5156_v55 }
 0x1b7   : > { %v3566_v28 = vpop.f32.mrf.mxu0  ;;  %v3654_v38 = vpop.f32.mrf.mxu1 }
 0x1b8   : > { %v3567_v42 = vadd.f32 %v3566_v28, %v3565_v60  ;;  %v3655_v33 = vadd.f32 %v3654_v38, %v3653_v57 }
 0x1b9   : > { %v3568_v15 = vpop.f32.mrf.mxu0  ;;  %2296 = vmatmul.mubr.bf16.gmra.mxu0 %v5147_v50  ;;  %v3656_v19 = vpop.f32.mrf.mxu1 }
 0x1ba   : > { %v5289_v61 = vadd.f32 %v5188_v35, %v3567_v42  ;;  %2303 = vmatprep.mubr.bf16.mxu0 %v5175_v5  ;;  %v5293_v36 = vadd.f32 %v3655_v33, %v5169_v17 }
 0x1bb   : > { %v3569_v14 = vpop.f32.mrf.mxu0  ;;  %v3657_v50 = vpop.f32.mrf.mxu1 }
 0x1bc   : > { %v3570_v1 = vadd.f32 %v3569_v14, %v3568_v15  ;;  %v3658_v55 = vadd.f32 %v3657_v50, %v3656_v19 }
 0x1bd   : > { %v3571_v44 = vpop.f32.mrf.mxu0  ;;  %v3659_v7 = vpop.f32.mrf.mxu1 }
 0x1be   : > { %v5296_v18 = vadd.f32 %v3570_v1, %v5203_v46  ;;  %v5302_v5 = vadd.f32 %v3658_v55, %v5184_v16 }
 0x1bf   : > { %v3572_v53 = vpop.f32.mrf.mxu0  ;;  %v3660_v32 = vpop.f32.mrf.mxu1 }
 0x1c0   : > { %v5298_v35 = vadd.f32 %v3572_v53, %v3571_v44  ;;  %v3661_v3 = vadd.f32 %v3660_v32, %v3659_v7 }
 0x1c1   : > { %v3574_v56 = vpop.f32.mrf.mxu0  ;;  %2304 = vmatmul.mubr.bf16.gmra.mxu0 %v5166_v6  ;;  %v3662_v17 = vpop.f32.mrf.mxu1 }
 0x1c2   : > { %v5305_v46 = vadd.f32 %v3661_v3, %v5193_v49 }
 0x1c3   : > { %v3575_v59 = vpop.f32.mrf.mxu0  ;;  %v3663_v60 = vpop.f32.mrf.mxu1 }
 0x1c4   : > { %v3576_v0 = vadd.f32 %v3575_v59, %v3574_v56  ;;  %v3664_v27 = vadd.f32 %v3663_v60, %v3662_v17 }
 0x1c5   : > { %v3577_v54 = vpop.f32.mrf.mxu0  ;;  %v3665_v28 = vpop.f32.mrf.mxu1 }
 0x1c6   : > { %v5308_v22 = vadd.f32 %v5198_v11, %v3576_v0  ;;  %v1654_v16 = vadd.f32 %v3664_v27, %v5201_v31 }
 0x1c7   : > { %v3578_v47 = vpop.f32.mrf.mxu0  ;;  %v3666_v15 = vpop.f32.mrf.mxu1 }
 0x1c8   : > { %v3579_v6 = vadd.f32 %v3578_v47, %v3577_v54  ;;  %v3667_v49 = vadd.f32 %v3666_v15, %v3665_v28 }
 0x1c9   : > { %v3966_v57 = vpop.f32.mrf.mxu0  ;;  %v3668_v14 = vpop.f32.mrf.mxu1 }
 0x1ca   : > { %v5312_v42 = vadd.f32 %v5205_v40, %v3579_v6  ;;  %v5315_v38 = vadd.f32 %v3966_v57, %v5232_v51  ;;  %v1657_v1 = vadd.f32 %v3667_v49, %v5209_v13  ;;  %v1360_v13 = vadd.f32 %v5217_v12, %v5143_v34 }
 0x1cb   : > { %v1758_v33 = vpop.f32.mrf.mxu0  ;;  %v3669_v44 = vpop.f32.mrf.mxu1 }
 0x1cc   : > { %v5318_v11 = vadd.f32 %v1758_v33, %v5221_v20  ;;  %v3670_v31 = vadd.f32 %v3669_v44, %v3668_v14 }
 0x1cd   : > { %v3967_v19 = vpop.f32.mrf.mxu0  ;;  %v3671_v55 = vpop.f32.mrf.mxu1 }
 0x1ce   : > { %v5322_v50 = vadd.f32 %v3967_v19, %v5239_v43  ;;  %v1662_v7 = vadd.f32 %v3670_v31, %v5215_v10 }
 0x1cf   : > { %v1761_v40 = vpop.f32.mrf.mxu0  ;;  %v3672_v56 = vpop.f32.mrf.mxu1 }
 0x1d0   : > { %v5325_v53 = vadd.f32 %v1761_v40, %v5225_v62  ;;  %v3673_v32 = vadd.f32 %v3672_v56, %v3671_v55 }
 0x1d1   : > { %v3970_v51 = vpop.f32.mrf.mxu0  ;;  %v3674_v43 = vpop.f32.mrf.mxu1 }
 0x1d2   : > { %v5329_v20 = vadd.f32 %v3970_v51, %v5259_v24  ;;  %v1665_v0 = vadd.f32 %v3673_v32, %v1360_v13 }
 0x1d3   : > { %v1774_v3 = vpop.f32.mrf.mxu0  ;;  %v3675_v62 = vpop.f32.mrf.mxu1 }
 0x1d4   : > { %v5334_v59 = vadd.f32 %v1774_v3, %v5248_v9  ;;  %v3676_v10 = vadd.f32 %v3675_v62, %v3674_v43 }
 0x1d5   : > { %v3971_v17 = vpop.f32.mrf.mxu0  ;;  %v3677_v27 = vpop.f32.mrf.mxu1 }
 0x1d6   : > { %v5337_v54 = vadd.f32 %v3971_v17, %v5266_v30  ;;  %v1670_v34 = vadd.f32 %v3676_v10, %v5228_v58 }
 0x1d7   : > { %v1777_v60 = vpop.f32.mrf.mxu0  ;;  %v3678_v12 = vpop.f32.mrf.mxu1 }
 0x1d8   : > { %v5340_v24 = vadd.f32 %v1777_v60, %v5252_v63  ;;  %v3679_v9 = vadd.f32 %v3678_v12, %v3677_v27 }
 0x1d9   : > { %v3974_v47 = vpop.f32.mrf.mxu0  ;;  %v3680_v57 = vpop.f32.mrf.mxu1 }
 0x1da   : > { %v5344_v28 = vadd.f32 %v3974_v47, %v5286_v39  ;;  %v1673_v49 = vadd.f32 %v3679_v9, %v5235_v2 }
 0x1db   : > { %v1790_v6 = vpop.f32.mrf.mxu0  ;;  %v3681_v33 = vpop.f32.mrf.mxu1 }
 0x1dc   : > { %v5347_v15 = vadd.f32 %v1790_v6, %v5275_v52  ;;  %v3682_v14 = vadd.f32 %v3681_v33, %v3680_v57  ;;  %v1376_v52 = vadd.f32 %v5244_v37, %v5171_v21 }
 0x1dd   : > { %v3975_v30 = vpop.f32.mrf.mxu0  ;;  %v3683_v58 = vpop.f32.mrf.mxu1 }
 0x1de   : > { %v5351_v63 = vadd.f32 %v3975_v30, %v5293_v36  ;;  %v1678_v31 = vadd.f32 %v3682_v14, %v5242_v25 }
 0x1df   : > { %v1793_v19 = vpop.f32.mrf.mxu0  ;;  %v3684_v40 = vpop.f32.mrf.mxu1 }
 0x1e0   : > { %v5354_v44 = vadd.f32 %v1793_v19, %v5279_v26  ;;  %v3685_v2 = vadd.f32 %v3684_v40, %v3683_v58 }
 0x1e1   : > { %v3978_v39 = vpop.f32.mrf.mxu0  ;;  %v3686_v56 = vpop.f32.mrf.mxu1 }
 0x1e2   : > { %v5357_v55 = vadd.f32 %v3978_v39, %v1654_v16  ;;  %v1681_v32 = vadd.f32 %v3685_v2, %v1376_v52 }
 0x1e3   : > { %v1806_v51 = vpop.f32.mrf.mxu0  ;;  %v3687_v3 = vpop.f32.mrf.mxu1 }
 0x1e4   : > { %v5362_v36 = vadd.f32 %v1806_v51, %v5302_v5  ;;  %v3688_v43 = vadd.f32 %v3687_v3, %v3686_v56 }
 0x1e5   : > { %v3979_v13 = vpop.f32.mrf.mxu0  ;;  %v3689_v25 = vpop.f32.mrf.mxu1 }
 0x1e6   : > { %v5364_v26 = vadd.f32 %v3979_v13, %v1657_v1  ;;  %v1686_v21 = vadd.f32 %v3688_v43, %v5255_v29 }
 0x1e7   : > { %v1809_v17 = vpop.f32.mrf.mxu0  ;;  %v3690_v37 = vpop.f32.mrf.mxu1 }
 0x1e8   : > { %v5367_v16 = vadd.f32 %v1809_v17, %v5305_v46  ;;  %v3691_v60 = vadd.f32 %v3690_v37, %v3689_v25 }
 0x1e9   : > { %v3982_v62 = vpop.f32.mrf.mxu0  ;;  %v3692_v27 = vpop.f32.mrf.mxu1 }
 0x1ea   : > { %v5370_v10 = vadd.f32 %v3982_v62, %v1670_v34  ;;  %v1689_v1 = vadd.f32 %v3691_v60, %v5262_v4 }
 0x1eb   : > { %v1822_v5 = vpop.f32.mrf.mxu0  ;;  %v3693_v9 = vpop.f32.mrf.mxu1 }
 0x1ec   : > { %v5372_v47 = vadd.f32 %v1822_v5, %v1662_v7  ;;  %v3694_v57 = vadd.f32 %v3693_v9, %v3692_v27  ;;  %v1392_v7 = vadd.f32 %v5271_v8, %v5195_v48 }
 0x1ed   : > { %v3983_v12 = vpop.f32.mrf.mxu0  ;;  %v3695_v30 = vpop.f32.mrf.mxu1 }
 0x1ee   : > { %v5375_v6 = vadd.f32 %v3983_v12, %v1673_v49  ;;  %v1694_v34 = vadd.f32 %v3694_v57, %v5269_v45 }
 0x1ef   : > { %v1825_v46 = vpop.f32.mrf.mxu0  ;;  %v3696_v14 = vpop.f32.mrf.mxu1 }
 0x1f0   : > { %v5377_v33 = vadd.f32 %v1825_v46, %v1665_v0  ;;  %v3697_v58 = vadd.f32 %v3696_v14, %v3695_v30  ;;  %v1408_v46 = vadd.f32 %v5298_v35, %v5211_v41 }
 0x1f1   : > { %v3986_v29 = vpop.f32.mrf.mxu0  ;;  %v3698_v4 = vpop.f32.mrf.mxu1 }
 0x1f2   : > { %v5380_v19 = vadd.f32 %v3986_v29, %v1686_v21  ;;  %v1697_v52 = vadd.f32 %v3697_v58, %v1392_v7 }
 0x1f3   : > { %v1838_v39 = vpop.f32.mrf.mxu0  ;;  %v3699_v2 = vpop.f32.mrf.mxu1 }
 0x1f4   : > { %v5384_v40 = vadd.f32 %v1838_v39, %v1678_v31  ;;  %v3700_v0 = vadd.f32 %v3699_v2, %v3698_v4 }
 0x1f5   : > { %v3987_v49 = vpop.f32.mrf.mxu0  ;;  %v3701_v13 = vpop.f32.mrf.mxu1 }
 0x1f6   : > { %v5386_v51 = vadd.f32 %v3987_v49, %v1689_v1  ;;  %v1702_v3 = vadd.f32 %v3700_v0, %v5282_v23 }
 0x1f7   : > { %v1841_v56 = vpop.f32.mrf.mxu0  ;;  %v3702_v17 = vpop.f32.mrf.mxu1 }
 0x1f8   : > { %v5388_v45 = vadd.f32 %v1841_v56, %v1681_v32  ;;  %v3703_v48 = vadd.f32 %v3702_v17, %v3701_v13 }
 0x1f9   : > { %v3990_v43 = vpop.f32.mrf.mxu0  ;;  %v3704_v31 = vpop.f32.mrf.mxu1 }
 0x1fa   : > { %v5391_v8 = vadd.f32 %v3990_v43, %v1702_v3  ;;  %v1705_v21 = vadd.f32 %v3703_v48, %v5289_v61 }
 0x1fb   : > { %v1854_v25 = vpop.f32.mrf.mxu0  ;;  %v3705_v60 = vpop.f32.mrf.mxu1 }
 0x1fc   : > { %v5393_v62 = vadd.f32 %v1854_v25, %v1694_v34  ;;  %v3706_v5 = vadd.f32 %v3705_v60, %v3704_v31 }
 0x1fd   : > { %v3991_v37 = vpop.f32.mrf.mxu0  ;;  %v3707_v12 = vpop.f32.mrf.mxu1 }
 0x1fe   : > { %v5396_v27 = vadd.f32 %v3991_v37, %v1705_v21  ;;  %v1710_v9 = vadd.f32 %v3706_v5, %v5296_v18 }
 0x1ff   : > { %v1857_v32 = vpop.f32.mrf.mxu0  ;;  %v3708_v57 = vpop.f32.mrf.mxu1 }
 0x200   : > { %v5398_v1 = vadd.f32 %v1857_v32, %v1697_v52  ;;  %v3709_v30 = vadd.f32 %v3708_v57, %v3707_v12 }
 0x201   : > { %v3994_v23 = vpop.f32.mrf.mxu0  ;;  %v3710_v34 = vpop.f32.mrf.mxu1 }
 0x202   : > { %v1713_v7 = vadd.f32 %v3709_v30, %v1408_v46  ;;  %v5423_v46 = vld [vmem:[%s5634_s4] ss:$0 sm:$0xff] }
 0x203   : > { %v1870_v29 = vpop.f32.mrf.mxu0  ;;  %v3711_v58 = vpop.f32.mrf.mxu1 }
 0x204   : > { %v5403_v61 = vadd.f32 %v1870_v29, %v1710_v9  ;;  %v3712_v39 = vadd.f32 %v3711_v58, %v3710_v34 }
 0x205   : > { %v3995_v14 = vpop.f32.mrf.mxu0  ;;  %v3713_v49 = vpop.f32.mrf.mxu1 }
 0x206   : > { %v1718_v2 = vadd.f32 %v3712_v39, %v5308_v22  ;;  %v5416_v22 = vld [vmem:[%s5633_s3] ss:$0 sm:$0xff] }
 0x207   : > { %v1873_v4 = vpop.f32.mrf.mxu0  ;;  %v3714_v0 = vpop.f32.mrf.mxu1 }
 0x208   : > { %v5405_v52 = vadd.f32 %v1873_v4, %v1713_v7  ;;  %v5408_v56 = vadd.f32 %v3994_v23, %v1718_v2  ;;  %v3715_v41 = vadd.f32 %v3714_v0, %v3713_v49 }
 0x209   : > { %v3756_v18 = vpop.f32.mrf.mxu0  ;;  %v4014_v3 = vpop.f32.mrf.mxu1 }
 0x20a   : > { %v1721_v43 = vadd.f32 %v3715_v41, %v5312_v42 }
 0x20b   : > { %v3757_v35 = vpop.f32.mrf.mxu0  ;;  %v2346_v48 = vpop.f32.mrf.mxu1 }
 0x20c   : > { %v3758_v13 = vadd.f32 %v3757_v35, %v3756_v18  ;;  %v5411_v25 = vadd.f32 %v3995_v14, %v1721_v43 }
 0x20d   : > { %v3759_v17 = vpop.f32.mrf.mxu0  ;;  %v4015_v60 = vpop.f32.mrf.mxu1 }
 0x20e   : > { %v2347_v31 = vadd.f32 %v3758_v13, %v2346_v48 }
 0x20f   : > { %v3760_v21 = vpop.f32.mrf.mxu0  ;;  %v2349_v12 = vpop.f32.mrf.mxu1 }
 0x210   : > { %v3761_v37 = vadd.f32 %v3760_v21, %v3759_v17  ;;  %v2473_v5 = vadd.f32 %v2347_v31, %v5318_v11 }
 0x211   : > { %v3762_v32 = vpop.f32.mrf.mxu0  ;;  %v4018_v30 = vpop.f32.mrf.mxu1 }
 0x212   : > { %v2512_v23 = vmul.f32 %v5416_v22, %v2473_v5  ;;  %v2350_v42 = vadd.f32 %v3761_v37, %v2349_v12 }
 0x213   : > { %v3763_v9 = vpop.f32.mrf.mxu0  ;;  %v2362_v58 = vpop.f32.mrf.mxu1 }
 0x214   : > { %v3764_v57 = vadd.f32 %v3763_v9, %v3762_v32  ;;  %v2474_v29 = vadd.f32 %v2350_v42, %v5325_v53  ;;  %v2551_v39 = vadd.f32 %v5423_v46, %v2512_v23 }
 0x215   : > { %v3765_v34 = vpop.f32.mrf.mxu0  ;;  %v4019_v43 = vpop.f32.mrf.mxu1 }
 0x216   : > { %v2355_v14 = vadd.f32 %v4014_v3, %v3764_v57  ;;  %v2513_v7 = vmul.f32 %v5416_v22, %v2474_v29  ;;  %v2583_v13 = vmax.f32 %v2551_v39, 0.0 }
 0x217   : > { %v3766_v11 = vpop.f32.mrf.mxu0  ;;  %v2365_v32 = vpop.f32.mrf.mxu1 }
 0x218   : > { %v2475_v4 = vadd.f32 %v2355_v14, %v5315_v38  ;;  %v3767_v49 = vadd.f32 %v3766_v11, %v3765_v34  ;;  %v2552_v18 = vadd.f32 %v5423_v46, %v2513_v7 }
 0x219   : > { %v3768_v2 = vpop.f32.mrf.mxu0  ;;  %v4022_v14 = vpop.f32.mrf.mxu1 }
 0x21a   : > { %v2514_v0 = vmul.f32 %v5416_v22, %v2475_v4  ;;  %v2358_v41 = vadd.f32 %v4015_v60, %v3767_v49  ;;  %v2584_v53 = vmax.f32 %v2552_v18, 0.0 }
 0x21b   : > { %v3769_v35 = vpop.f32.mrf.mxu0  ;;  %v2378_v18 = vpop.f32.mrf.mxu1 }
 0x21c   : > { %v2476_v3 = vadd.f32 %v2358_v41, %v5322_v50  ;;  %v3770_v17 = vadd.f32 %v3769_v35, %v3768_v2  ;;  %v2615_v31 = vpack.c.bf16 %v2584_v53, %v2583_v13  ;;  %v2553_v21 = vadd.f32 %v5423_v46, %v2514_v0 }
 0x21d   : > { %v3771_v48 = vpop.f32.mrf.mxu0 }
 0x21e   : > { %v2515_v38 = vmul.f32 %v5416_v22, %v2476_v3  ;;  %v2363_v37 = vadd.f32 %v3770_v17, %v2362_v58  ;;  %4060 = vmatprep.mubr.bf16.mxu1 %v2615_v31  ;;  %v2585_v9 = vmax.f32 %v2553_v21, 0.0  ;;  %v4023_v31 = vpop.f32.mrf.mxu1 }
 0x21f   : > { %v3772_v5 = vpop.f32.mrf.mxu0 }
 0x220   : > { %v2554_v12 = vadd.f32 %v5423_v46, %v2515_v38  ;;  %v2477_v60 = vadd.f32 %v2363_v37, %v5334_v59  ;;  %v3773_v23 = vadd.f32 %v3772_v5, %v3771_v48 }
 0x221   : > { %v3774_v42 = vpop.f32.mrf.mxu0 }
 0x222   : > { %v2586_v57 = vmax.f32 %v2554_v12, 0.0  ;;  %v2516_v50 = vmul.f32 %v5416_v22, %v2477_v60  ;;  %v2366_v29 = vadd.f32 %v3773_v23, %v2365_v32  ;;  %v2381_v60 = vpop.f32.mrf.mxu1 }
 0x223   : > { %v3775_v34 = vpop.f32.mrf.mxu0 }
 0x224   : > { %v2616_v7 = vpack.c.bf16 %v2586_v57, %v2585_v9  ;;  %v2478_v11 = vadd.f32 %v2366_v29, %v5340_v24  ;;  %v3776_v58 = vadd.f32 %v3775_v34, %v3774_v42  ;;  %v2555_v59 = vadd.f32 %v5423_v46, %v2516_v50 }
 0x225   : > { %v3777_v39 = vpop.f32.mrf.mxu0 }
 0x226   : > { %v2517_v4 = vmul.f32 %v5416_v22, %v2478_v11  ;;  %v2371_v49 = vadd.f32 %v4018_v30, %v3776_v58  ;;  %4061 = vmatmul.mubr.bf16.vlgmr.msra.gmra.mxu1 %v2616_v7  ;;  %v2587_v24 = vmax.f32 %v2555_v59, 0.0  ;;  %v4026_v7 = vpop.f32.mrf.mxu1 }
 0x227   : > { %v3778_v2 = vpop.f32.mrf.mxu0 }
 0x228   : > { %v2479_v0 = vadd.f32 %v2371_v49, %v5329_v20  ;;  %v3779_v41 = vadd.f32 %v3778_v2, %v3777_v39  ;;  %v2556_v35 = vadd.f32 %v5423_v46, %v2517_v4 }
 0x229   : > { %v3780_v13 = vpop.f32.mrf.mxu0 }
 0x22a   : > { %v2518_v53 = vmul.f32 %v5416_v22, %v2479_v0  ;;  %v2374_v3 = vadd.f32 %v4019_v43, %v3779_v41  ;;  %v2588_v17 = vmax.f32 %v2556_v35, 0.0 }
 0x22b   : > { %v3781_v48 = vpop.f32.mrf.mxu0 }
 0x22c   : > { %v2480_v30 = vadd.f32 %v2374_v3, %v5337_v54  ;;  %v3782_v21 = vadd.f32 %v3781_v48, %v3780_v13  ;;  %v2617_v38 = vpack.c.bf16 %v2588_v17, %v2587_v24  ;;  %v2557_v5 = vadd.f32 %v5423_v46, %v2518_v53 }
 0x22d   : > { %v3783_v37 = vpop.f32.mrf.mxu0 }
 0x22e   : > { %v2519_v20 = vmul.f32 %v5416_v22, %v2480_v30  ;;  %v2379_v32 = vadd.f32 %v3782_v21, %v2378_v18  ;;  %4064 = vmatprep.mubr.bf16.mxu1 %v2617_v38  ;;  %v2589_v57 = vmax.f32 %v2557_v5, 0.0  ;;  %v2394_v18 = vpop.f32.mrf.mxu1 }
 0x22f   : > { %v3784_v12 = vpop.f32.mrf.mxu0 }
 0x230   : > { %v2558_v23 = vadd.f32 %v5423_v46, %v2519_v20  ;;  %v2481_v43 = vadd.f32 %v2379_v32, %v5347_v15  ;;  %v3785_v42 = vadd.f32 %v3784_v12, %v3783_v37  ;;  %v4027_v48 = vpop.f32.mrf.mxu1 }
 0x231   : > { %v3786_v9 = vpop.f32.mrf.mxu0 }
 0x232   : > { %v2590_v50 = vmax.f32 %v2558_v23, 0.0  ;;  %v2520_v54 = vmul.f32 %v5416_v22, %v2481_v43  ;;  %v2382_v29 = vadd.f32 %v3785_v42, %v2381_v60  ;;  %v2397_v32 = vpop.f32.mrf.mxu1 }
 0x233   : > { %v3787_v34 = vpop.f32.mrf.mxu0 }
 0x234   : > { %v2482_v11 = vadd.f32 %v2382_v29, %v5354_v44  ;;  %v3788_v58 = vadd.f32 %v3787_v34, %v3786_v9  ;;  %v2618_v39 = vpack.c.bf16 %v2590_v50, %v2589_v57  ;;  %v2559_v15 = vadd.f32 %v5423_v46, %v2520_v54  ;;  %v4030_v50 = vpop.f32.mrf.mxu1 }
 0x235   : > { %v3789_v4 = vpop.f32.mrf.mxu0 }
 0x236   : > { %v2521_v49 = vmul.f32 %v5416_v22, %v2482_v11  ;;  %v2387_v59 = vadd.f32 %v4022_v14, %v3788_v58  ;;  %4065 = vmatmul.mubr.bf16.gmra.mxu1 %v2618_v39  ;;  %v2591_v3 = vmax.f32 %v2559_v15, 0.0 }
 0x237   : > { %v3790_v2 = vpop.f32.mrf.mxu0 }
 0x238   : > { %v2483_v0 = vadd.f32 %v2387_v59, %v5344_v28  ;;  %v3791_v41 = vadd.f32 %v3790_v2, %v3789_v4  ;;  %v2560_v35 = vadd.f32 %v5423_v46, %v2521_v49  ;;  %v2410_v49 = vpop.f32.mrf.mxu1 }
 0x239   : > { %v3792_v13 = vpop.f32.mrf.mxu0 }
 0x23a   : > { %v2522_v53 = vmul.f32 %v5416_v22, %v2483_v0  ;;  %v2390_v44 = vadd.f32 %v4023_v31, %v3791_v41  ;;  %v2592_v24 = vmax.f32 %v2560_v35, 0.0 }
 0x23b   : > { %v3793_v17 = vpop.f32.mrf.mxu0 }
 0x23c   : > { %v2484_v14 = vadd.f32 %v2390_v44, %v5351_v63  ;;  %v3794_v30 = vadd.f32 %v3793_v17, %v3792_v13  ;;  %v2619_v21 = vpack.c.bf16 %v2592_v24, %v2591_v3  ;;  %v2561_v37 = vadd.f32 %v5423_v46, %v2522_v53  ;;  %v4031_v53 = vpop.f32.mrf.mxu1 }
 0x23d   : > { %v3795_v38 = vpop.f32.mrf.mxu0 }
 0x23e   : > { %v2523_v28 = vmul.f32 %v5416_v22, %v2484_v14  ;;  %v2395_v5 = vadd.f32 %v3794_v30, %v2394_v18  ;;  %4068 = vmatprep.mubr.bf16.mxu1 %v2619_v21  ;;  %v2593_v43 = vmax.f32 %v2561_v37, 0.0  ;;  %v2413_v21 = vpop.f32.mrf.mxu1 }
 0x23f   : > { %v3796_v20 = vpop.f32.mrf.mxu0 }
 0x240   : > { %v2562_v12 = vadd.f32 %v5423_v46, %v2523_v28  ;;  %v2485_v31 = vadd.f32 %v2395_v5, %v5362_v36  ;;  %v3797_v60 = vadd.f32 %v3796_v20, %v3795_v38 }
 0x241   : > { %v3798_v23 = vpop.f32.mrf.mxu0 }
 0x242   : > { %v2594_v42 = vmax.f32 %v2562_v12, 0.0  ;;  %v2524_v63 = vmul.f32 %v5416_v22, %v2485_v31  ;;  %v2398_v9 = vadd.f32 %v3797_v60, %v2397_v32  ;;  %v4034_v31 = vpop.f32.mrf.mxu1 }
 0x243   : > { %v3799_v57 = vpop.f32.mrf.mxu0 }
 0x244   : > { %v2486_v54 = vadd.f32 %v2398_v9, %v5367_v16  ;;  %v3800_v29 = vadd.f32 %v3799_v57, %v3798_v23  ;;  %v2620_v34 = vpack.c.bf16 %v2594_v42, %v2593_v43  ;;  %v2563_v36 = vadd.f32 %v5423_v46, %v2524_v63 }
 0x245   : > { %v3801_v11 = vpop.f32.mrf.mxu0 }
 0x246   : > { %v2525_v58 = vmul.f32 %v5416_v22, %v2486_v54  ;;  %v2403_v39 = vadd.f32 %v4026_v7, %v3800_v29  ;;  %4069 = vmatmul.mubr.bf16.gmra.mxu1 %v2620_v34  ;;  %v2595_v41 = vmax.f32 %v2563_v36, 0.0  ;;  %v2426_v54 = vpop.f32.mrf.mxu1 }
 0x247   : > { %v3802_v4 = vpop.f32.mrf.mxu0 }
 0x248   : > { %v2487_v59 = vadd.f32 %v2403_v39, %v5357_v55  ;;  %v3803_v15 = vadd.f32 %v3802_v4, %v3801_v11  ;;  %v2564_v2 = vadd.f32 %v5423_v46, %v2525_v58 }
 0x249   : > { %v3804_v18 = vpop.f32.mrf.mxu0 }
 0x24a   : > { %v2526_v0 = vmul.f32 %v5416_v22, %v2487_v59  ;;  %v2406_v16 = vadd.f32 %v4027_v48, %v3803_v15  ;;  %v2596_v35 = vmax.f32 %v2564_v2, 0.0  ;;  %v4035_v59 = vpop.f32.mrf.mxu1 }
 0x24b   : > { %v3805_v13 = vpop.f32.mrf.mxu0 }
 0x24c   : > { %v2488_v7 = vadd.f32 %v2406_v16, %v5364_v26  ;;  %v3806_v44 = vadd.f32 %v3805_v13, %v3804_v18  ;;  %v2621_v3 = vpack.c.bf16 %v2596_v35, %v2595_v41  ;;  %v2565_v17 = vadd.f32 %v5423_v46, %v2526_v0  ;;  %v2429_v35 = vpop.f32.mrf.mxu1 }
 0x24d   : > { %v3807_v24 = vpop.f32.mrf.mxu0 }
 0x24e   : > { %v2527_v55 = vmul.f32 %v5416_v22, %v2488_v7  ;;  %v2411_v14 = vadd.f32 %v3806_v44, %v2410_v49  ;;  %4072 = vmatprep.mubr.bf16.mxu1 %v2621_v3  ;;  %v2597_v5 = vmax.f32 %v2565_v17, 0.0 }
 0x24f   : > { %v3808_v30 = vpop.f32.mrf.mxu0 }
 0x250   : > { %v2566_v38 = vadd.f32 %v5423_v46, %v2527_v55  ;;  %v2489_v48 = vadd.f32 %v2411_v14, %v5372_v47  ;;  %v3809_v37 = vadd.f32 %v3808_v30, %v3807_v24  ;;  %v4038_v14 = vpop.f32.mrf.mxu1 }
 0x251   : > { %v3810_v28 = vpop.f32.mrf.mxu0 }
 0x252   : > { %v2598_v20 = vmax.f32 %v2566_v38, 0.0  ;;  %v2528_v26 = vmul.f32 %v5416_v22, %v2489_v48  ;;  %v2414_v32 = vadd.f32 %v3809_v37, %v2413_v21 }
 0x253   : > { %v3811_v12 = vpop.f32.mrf.mxu0 }
 0x254   : > { %v2490_v60 = vadd.f32 %v2414_v32, %v5377_v33  ;;  %v3812_v23 = vadd.f32 %v3811_v12, %v3810_v28  ;;  %v2622_v43 = vpack.c.bf16 %v2598_v20, %v2597_v5  ;;  %v2567_v47 = vadd.f32 %v5423_v46, %v2528_v26  ;;  %v2442_v20 = vpop.f32.mrf.mxu1 }
 0x255   : > { %v3813_v42 = vpop.f32.mrf.mxu0 }
 0x256   : > { %v2529_v63 = vmul.f32 %v5416_v22, %v2490_v60  ;;  %v2419_v9 = vadd.f32 %v4030_v50, %v3812_v23  ;;  %4073 = vmatmul.mubr.bf16.gmra.mxu1 %v2622_v43  ;;  %v2599_v36 = vmax.f32 %v2567_v47, 0.0 }
 0x257   : > { %v3814_v57 = vpop.f32.mrf.mxu0 }
 0x258   : > { %v2491_v29 = vadd.f32 %v2419_v9, %v5370_v10  ;;  %v3815_v34 = vadd.f32 %v3814_v57, %v3813_v42  ;;  %v2568_v11 = vadd.f32 %v5423_v46, %v2529_v63  ;;  %v4039_v9 = vpop.f32.mrf.mxu1 }
 0x259   : > { %v3816_v58 = vpop.f32.mrf.mxu0 }
 0x25a   : > { %v2530_v39 = vmul.f32 %v5416_v22, %v2491_v29  ;;  %v2422_v33 = vadd.f32 %v4031_v53, %v3815_v34  ;;  %v2600_v4 = vmax.f32 %v2568_v11, 0.0 }
 0x25b   : > { %v3817_v49 = vpop.f32.mrf.mxu0 }
 0x25c   : > { %v2492_v50 = vadd.f32 %v2422_v33, %v5375_v6  ;;  %v3818_v15 = vadd.f32 %v3817_v49, %v3816_v58  ;;  %v2623_v2 = vpack.c.bf16 %v2600_v4, %v2599_v36  ;;  %v2569_v0 = vadd.f32 %v5423_v46, %v2530_v39  ;;  %v2445_v58 = vpop.f32.mrf.mxu1 }
 0x25d   : > { %v3819_v18 = vpop.f32.mrf.mxu0 }
 0x25e   : > { %v2531_v10 = vmul.f32 %v5416_v22, %v2492_v50  ;;  %v2427_v16 = vadd.f32 %v3818_v15, %v2426_v54  ;;  %4076 = vmatprep.mubr.bf16.mxu1 %v2623_v2  ;;  %v2601_v3 = vmax.f32 %v2569_v0, 0.0  ;;  %v4042_v2 = vpop.f32.mrf.mxu1 }
 0x25f   : > { %v3820_v41 = vpop.f32.mrf.mxu0 }
 0x260   : > { %v2570_v13 = vadd.f32 %v5423_v46, %v2531_v10  ;;  %v2493_v53 = vadd.f32 %v2427_v16, %v5384_v40  ;;  %v3821_v7 = vadd.f32 %v3820_v41, %v3819_v18 }
 0x261   : > { %v3822_v44 = vpop.f32.mrf.mxu0 }
 0x262   : > { %v2602_v24 = vmax.f32 %v2570_v13, 0.0  ;;  %v2532_v6 = vmul.f32 %v5416_v22, %v2493_v53  ;;  %v2430_v17 = vadd.f32 %v3821_v7, %v2429_v35  ;;  %v2458_v53 = vpop.f32.mrf.mxu1 }
 0x263   : > { %v3823_v55 = vpop.f32.mrf.mxu0 }
 0x264   : > { %v2494_v30 = vadd.f32 %v2430_v17, %v5388_v45  ;;  %v3824_v21 = vadd.f32 %v3823_v55, %v3822_v44  ;;  %v2624_v38 = vpack.c.bf16 %v2602_v24, %v2601_v3  ;;  %v2571_v40 = vadd.f32 %v5423_v46, %v2532_v6 }
 0x265   : > { %v3825_v48 = vpop.f32.mrf.mxu0 }
 0x266   : > { %v2533_v37 = vmul.f32 %v5416_v22, %v2494_v30  ;;  %v2435_v28 = vadd.f32 %v4034_v31, %v3824_v21  ;;  %4077 = vmatmul.mubr.bf16.gmra.mxu1 %v2624_v38  ;;  %v2603_v43 = vmax.f32 %v2571_v40, 0.0  ;;  %v4043_v21 = vpop.f32.mrf.mxu1 }
 0x267   : > { %v3826_v5 = vpop.f32.mrf.mxu0 }
 0x268   : > { %v2495_v26 = vadd.f32 %v2435_v28, %v5380_v19  ;;  %v3827_v32 = vadd.f32 %v3826_v5, %v3825_v48  ;;  %v2572_v12 = vadd.f32 %v5423_v46, %v2533_v37 }
 0x269   : > { %v3828_v60 = vpop.f32.mrf.mxu0 }
 0x26a   : > { %v2534_v23 = vmul.f32 %v5416_v22, %v2495_v26  ;;  %v2438_v45 = vadd.f32 %v4035_v59, %v3827_v32  ;;  %v2604_v42 = vmax.f32 %v2572_v12, 0.0 }
 0x26b   : > { %v3829_v63 = vpop.f32.mrf.mxu0 }
 0x26c   : > { %v2496_v31 = vadd.f32 %v2438_v45, %v5386_v51  ;;  %v3830_v47 = vadd.f32 %v3829_v63, %v3828_v60  ;;  %v2625_v57 = vpack.c.bf16 %v2604_v42, %v2603_v43  ;;  %v2573_v29 = vadd.f32 %v5423_v46, %v2534_v23 }
 0x26d   : > { %v3831_v54 = vpop.f32.mrf.mxu0 }
 0x26e   : > { %v2535_v19 = vmul.f32 %v5416_v22, %v2496_v31  ;;  %v2443_v34 = vadd.f32 %v3830_v47, %v2442_v20  ;;  %4080 = vmatprep.mubr.bf16.mxu1 %v2625_v57  ;;  %v2605_v49 = vmax.f32 %v2573_v29, 0.0  ;;  %v2461_v20 = vpop.f32.mrf.mxu1 }
 0x26f   : > { %v3832_v11 = vpop.f32.mrf.mxu0 }
 0x270   : > { %v2574_v39 = vadd.f32 %v5423_v46, %v2535_v19  ;;  %v2497_v33 = vadd.f32 %v2443_v34, %v5393_v62  ;;  %v3833_v36 = vadd.f32 %v3832_v11, %v3831_v54 }
 0x271   : > { %v3834_v4 = vpop.f32.mrf.mxu0 }
 0x272   : > { %v2606_v59 = vmax.f32 %v2574_v39, 0.0  ;;  %v2536_v51 = vmul.f32 %v5416_v22, %v2497_v33  ;;  %v2446_v50 = vadd.f32 %v3833_v36, %v2445_v58 }
 0x273   : > { %v3835_v15 = vpop.f32.mrf.mxu0 }
 0x274   : > { %v2498_v18 = vadd.f32 %v2446_v50, %v5398_v1  ;;  %v3836_v0 = vadd.f32 %v3835_v15, %v3834_v4  ;;  %v2626_v10 = vpack.c.bf16 %v2606_v59, %v2605_v49  ;;  %v2575_v62 = vadd.f32 %v5423_v46, %v2536_v51 }
 0x275   : > { %v3837_v16 = vpop.f32.mrf.mxu0 }
 0x276   : > { %v2537_v41 = vmul.f32 %v5416_v22, %v2498_v18  ;;  %v2451_v35 = vadd.f32 %v4038_v14, %v3836_v0  ;;  %4081 = vmatmul.mubr.bf16.gmra.mxu1 %v2626_v10  ;;  %v2607_v17 = vmax.f32 %v2575_v62, 0.0  ;;  %v5522_v18 = vld [vmem:[%s5636_s6] ss:$0 sm:$0xff] }
 0x277   : > { %v3838_v13 = vpop.f32.mrf.mxu0 }
 0x278   : > { %v2499_v7 = vadd.f32 %v2451_v35, %v5391_v8  ;;  %v3839_v44 = vadd.f32 %v3838_v13, %v3837_v16  ;;  %v2576_v3 = vadd.f32 %v5423_v46, %v2537_v41 }
 0x279   : > { %v3840_v24 = vpop.f32.mrf.mxu0 }
 0x27a   : > { %v2538_v6 = vmul.f32 %v5416_v22, %v2499_v7  ;;  %v2454_v1 = vadd.f32 %v4039_v9, %v3839_v44  ;;  %v2608_v55 = vmax.f32 %v2576_v3, 0.0 }
 0x27b   : > { %v3841_v30 = vpop.f32.mrf.mxu0 }
 0x27c   : > { %v2500_v14 = vadd.f32 %v2454_v1, %v5396_v27  ;;  %v3842_v38 = vadd.f32 %v3841_v30, %v3840_v24  ;;  %v2627_v48 = vpack.c.bf16 %v2608_v55, %v2607_v17  ;;  %v2577_v28 = vadd.f32 %v5423_v46, %v2538_v6 }
 0x27d   : > { %v3843_v37 = vpop.f32.mrf.mxu0 }
 0x27e   : > { %v2539_v8 = vmul.f32 %v5416_v22, %v2500_v14  ;;  %v2459_v40 = vadd.f32 %v3842_v38, %v2458_v53  ;;  %4084 = vmatprep.mubr.bf16.mxu1 %v2627_v48  ;;  %v2609_v23 = vmax.f32 %v2577_v28, 0.0 }
 0x27f   : > { %v3844_v5 = vpop.f32.mrf.mxu0 }
 0x280   : > { %v2578_v26 = vadd.f32 %v5423_v46, %v2539_v8  ;;  %v2501_v32 = vadd.f32 %v2459_v40, %v5403_v61  ;;  %v3845_v12 = vadd.f32 %v3844_v5, %v3843_v37 }
 0x281   : > { %v3846_v60 = vpop.f32.mrf.mxu0 }
 0x282   : > { %v2610_v45 = vmax.f32 %v2578_v26, 0.0  ;;  %v2540_v27 = vmul.f32 %v5416_v22, %v2501_v32  ;;  %v2462_v43 = vadd.f32 %v3845_v12, %v2461_v20 }
 0x283   : > { %v3847_v42 = vpop.f32.mrf.mxu0 }
 0x284   : > { %v2502_v63 = vadd.f32 %v2462_v43, %v5405_v52  ;;  %v3848_v9 = vadd.f32 %v3847_v42, %v3846_v60  ;;  %v2628_v31 = vpack.c.bf16 %v2610_v45, %v2609_v23  ;;  %v2579_v29 = vadd.f32 %v5423_v46, %v2540_v27 }
 0x285   : > { %v3849_v47 = vpop.f32.mrf.mxu0 }
 0x286   : > { %v2541_v57 = vmul.f32 %v5416_v22, %v2502_v63  ;;  %v2467_v54 = vadd.f32 %v4042_v2, %v3848_v9  ;;  %4085 = vmatmul.mubr.bf16.gmra.mxu1 %v2628_v31  ;;  %v2611_v52 = vmax.f32 %v2579_v29, 0.0 }
 0x287   : > { %v3850_v61 = vpop.f32.mrf.mxu0 }
 0x288   : > { %v2503_v19 = vadd.f32 %v2467_v54, %v5408_v56  ;;  %v3851_v34 = vadd.f32 %v3850_v61, %v3849_v47  ;;  %v2580_v11 = vadd.f32 %v5423_v46, %v2541_v57 }
 0x28a   : > { %v2542_v58 = vmul.f32 %v5416_v22, %v2503_v19  ;;  %v2470_v39 = vadd.f32 %v4043_v21, %v3851_v34  ;;  %v2612_v33 = vmax.f32 %v2580_v11, 0.0 }
 0x28c   : > { %v2504_v36 = vadd.f32 %v2470_v39, %v5411_v25  ;;  %v2629_v4 = vpack.c.bf16 %v2612_v33, %v2611_v52  ;;  %v2581_v49 = vadd.f32 %v5423_v46, %v2542_v58 }
 0x28e   : > { %v2543_v59 = vmul.f32 %v5416_v22, %v2504_v36  ;;  %4088 = vmatprep.mubr.bf16.mxu1 %v2629_v4  ;;  %v2613_v56 = vmax.f32 %v2581_v49, 0.0 }
 0x290   : > { %v2582_v51 = vadd.f32 %v5423_v46, %v2543_v59 }
 0x292   : > { %v2614_v50 = vmax.f32 %v2582_v51, 0.0 }
 0x294   : > { %v2630_v15 = vpack.c.bf16 %v2614_v50, %v2613_v56 }
 0x296   : > { %4089 = vmatmul.mubr.bf16.gmra.mxu1 %v2630_v15 }
 0x2e6   : > { %v4062_v2 = vpop.f32.mrf.mxu1 }
 0x2e7   : > { %v2745_v10 = vadd.f32 %v4062_v2, %v5522_v18 }
 0x2e8   : > { %v2736_v0 = vpop.f32.mrf.mxu1 }
 0x2e9   : > { %v2737_v46 = vadd.f32 %v5522_v18, %v2736_v0 }
 0x2ea   : > { %v4063_v25 = vpop.f32.mrf.mxu1 }
 0x2eb   : > { %v2748_v22 = vadd.f32 %v4063_v25, %v5522_v18 }
 0x2ec   : > { %v2739_v16 = vpop.f32.mrf.mxu1 }
 0x2ed   : > { %v3381_v41 = vpack.c.bf16 %v2748_v22, %v2745_v10  ;;  %v2740_v35 = vadd.f32 %v5522_v18, %v2739_v16 }
 0x2ef   : > { %3453 = vst [vmem:[%s5529_s22 + $0x8] sm:$0xff] %v3381_v41   ;;  %v3376_v62 = vpack.c.bf16 %v2740_v35, %v2737_v46 }
 0x2f1   : > { %3377 = vst [vmem:[%s5529_s22] sm:$0xff] %v3376_v62  }
 0x2f6   : > { %v4066_v13 = vpop.f32.mrf.mxu1 }
 0x2f7   : > { %v2761_v44 = vadd.f32 %v4066_v13, %v5522_v18 }
 0x2f8   : > { %v2752_v53 = vpop.f32.mrf.mxu1 }
 0x2f9   : > { %v2753_v6 = vadd.f32 %v5522_v18, %v2752_v53 }
 0x2fa   : > { %v4067_v7 = vpop.f32.mrf.mxu1 }
 0x2fb   : > { %v2764_v3 = vadd.f32 %v4067_v7, %v5522_v18 }
 0x2fc   : > { %v2755_v24 = vpop.f32.mrf.mxu1 }
 0x2fd   : > { %v3391_v1 = vpack.c.bf16 %v2764_v3, %v2761_v44  ;;  %v2756_v17 = vadd.f32 %v5522_v18, %v2755_v24 }
 0x2ff   : > { %3455 = vst [vmem:[%s5529_s22 + $0x18] sm:$0xff] %v3391_v1   ;;  %v3386_v55 = vpack.c.bf16 %v2756_v17, %v2753_v6 }
 0x301   : > { %3454 = vst [vmem:[%s5529_s22 + $0x10] sm:$0xff] %v3386_v55  }
 0x306   : > { %v4070_v30 = vpop.f32.mrf.mxu1 }
 0x307   : > { %v2777_v38 = vadd.f32 %v4070_v30, %v5522_v18 }
 0x308   : > { %v2768_v21 = vpop.f32.mrf.mxu1 }
 0x309   : > { %v2769_v28 = vadd.f32 %v5522_v18, %v2768_v21 }
 0x30a   : > { %v4071_v14 = vpop.f32.mrf.mxu1 }
 0x30b   : > { %v2780_v48 = vadd.f32 %v4071_v14, %v5522_v18 }
 0x30c   : > { %v2771_v37 = vpop.f32.mrf.mxu1 }
 0x30d   : > { %v3401_v8 = vpack.c.bf16 %v2780_v48, %v2777_v38  ;;  %v2772_v40 = vadd.f32 %v5522_v18, %v2771_v37 }
 0x30f   : > { %3457 = vst [vmem:[%s5529_s22 + $0x28] sm:$0xff] %v3401_v8   ;;  %v3396_v5 = vpack.c.bf16 %v2772_v40, %v2769_v28 }
 0x311   : > { %3456 = vst [vmem:[%s5529_s22 + $0x20] sm:$0xff] %v3396_v5  }
 0x316   : > { %v4074_v20 = vpop.f32.mrf.mxu1 }
 0x317   : > { %v2793_v12 = vadd.f32 %v4074_v20, %v5522_v18 }
 0x318   : > { %v2784_v26 = vpop.f32.mrf.mxu1 }
 0x319   : > { %v2785_v45 = vadd.f32 %v5522_v18, %v2784_v26 }
 0x31a   : > { %v4075_v32 = vpop.f32.mrf.mxu1 }
 0x31b   : > { %v2796_v60 = vadd.f32 %v4075_v32, %v5522_v18 }
 0x31c   : > { %v2787_v23 = vpop.f32.mrf.mxu1 }
 0x31d   : > { %v3411_v27 = vpack.c.bf16 %v2796_v60, %v2793_v12  ;;  %v2788_v43 = vadd.f32 %v5522_v18, %v2787_v23 }
 0x31f   : > { %3459 = vst [vmem:[%s5529_s22 + $0x38] sm:$0xff] %v3411_v27   ;;  %v3406_v42 = vpack.c.bf16 %v2788_v43, %v2785_v45 }
 0x321   : > { %3458 = vst [vmem:[%s5529_s22 + $0x30] sm:$0xff] %v3406_v42  }
 0x326   : > { %v4078_v63 = vpop.f32.mrf.mxu1 }
 0x327   : > { %v2809_v47 = vadd.f32 %v4078_v63, %v5522_v18 }
 0x328   : > { %v2800_v9 = vpop.f32.mrf.mxu1 }
 0x329   : > { %v2801_v29 = vadd.f32 %v5522_v18, %v2800_v9 }
 0x32a   : > { %v4079_v31 = vpop.f32.mrf.mxu1 }
 0x32b   : > { %v2812_v57 = vadd.f32 %v4079_v31, %v5522_v18 }
 0x32c   : > { %v2803_v54 = vpop.f32.mrf.mxu1 }
 0x32d   : > { %v3421_v61 = vpack.c.bf16 %v2812_v57, %v2809_v47  ;;  %v2804_v19 = vadd.f32 %v5522_v18, %v2803_v54 }
 0x32f   : > { %3461 = vst [vmem:[%s5529_s22 + $0x48] sm:$0xff] %v3421_v61   ;;  %v3416_v34 = vpack.c.bf16 %v2804_v19, %v2801_v29 }
 0x331   : > { %3460 = vst [vmem:[%s5529_s22 + $0x40] sm:$0xff] %v3416_v34  }
 0x336   : > { %v4082_v11 = vpop.f32.mrf.mxu1 }
 0x337   : > { %v2825_v52 = vadd.f32 %v4082_v11, %v5522_v18 }
 0x338   : > { %v2816_v58 = vpop.f32.mrf.mxu1 }
 0x339   : > { %v2817_v4 = vadd.f32 %v5522_v18, %v2816_v58 }
 0x33a   : > { %v4083_v39 = vpop.f32.mrf.mxu1 }
 0x33b   : > { %v2828_v33 = vadd.f32 %v4083_v39, %v5522_v18 }
 0x33c   : > { %v2819_v36 = vpop.f32.mrf.mxu1 }
 0x33d   : > { %v3431_v49 = vpack.c.bf16 %v2828_v33, %v2825_v52  ;;  %v2820_v59 = vadd.f32 %v5522_v18, %v2819_v36 }
 0x33f   : > { %3463 = vst [vmem:[%s5529_s22 + $0x58] sm:$0xff] %v3431_v49   ;;  %v3426_v51 = vpack.c.bf16 %v2820_v59, %v2817_v4 }
 0x341   : > { %3462 = vst [vmem:[%s5529_s22 + $0x50] sm:$0xff] %v3426_v51  }
 0x346   : > { %v4086_v56 = vpop.f32.mrf.mxu1 }
 0x347   : > { %v2841_v2 = vadd.f32 %v4086_v56, %v5522_v18 }
 0x348   : > { %v2832_v50 = vpop.f32.mrf.mxu1 }
 0x349   : > { %v2833_v10 = vadd.f32 %v5522_v18, %v2832_v50 }
 0x34a   : > { %v4087_v15 = vpop.f32.mrf.mxu1 }
 0x34b   : > { %v2844_v0 = vadd.f32 %v4087_v15, %v5522_v18 }
 0x34c   : > { %v2835_v25 = vpop.f32.mrf.mxu1 }
 0x34d   : > { %v3441_v22 = vpack.c.bf16 %v2844_v0, %v2841_v2  ;;  %v2836_v16 = vadd.f32 %v5522_v18, %v2835_v25 }
 0x34f   : > { %3465 = vst [vmem:[%s5529_s22 + $0x68] sm:$0xff] %v3441_v22   ;;  %v3436_v46 = vpack.c.bf16 %v2836_v16, %v2833_v10 }
 0x351   : > { %3464 = vst [vmem:[%s5529_s22 + $0x60] sm:$0xff] %v3436_v46  }
 0x356   : > { %v4090_v41 = vpop.f32.mrf.mxu1 }
 0x357   : > { %v2857_v13 = vadd.f32 %v4090_v41, %v5522_v18 }
 0x358   : > { %v2848_v35 = vpop.f32.mrf.mxu1 }
 0x359   : > { %v2849_v44 = vadd.f32 %v5522_v18, %v2848_v35 }
 0x35a   : > { %v4091_v62 = vpop.f32.mrf.mxu1 }
 0x35b   : > { %v2860_v53 = vadd.f32 %v4091_v62, %v5522_v18 }
 0x35c   : > { %v2851_v7 = vpop.f32.mrf.mxu1 }
 0x35d   : > { %v3451_v3 = vpack.c.bf16 %v2860_v53, %v2857_v13  ;;  %v2852_v24 = vadd.f32 %v5522_v18, %v2851_v7 }
 0x35f   : > { %3467 = vst [vmem:[%s5529_s22 + $0x78] sm:$0xff] %v3451_v3   ;;  %v3446_v6 = vpack.c.bf16 %v2852_v24, %v2849_v44 }
 0x361   : > { %3466 = vst [vmem:[%s5529_s22 + $0x70] sm:$0xff] %v3446_v6  }
 0x362   : > { %4435 = shalt.err (!%p4432_p12)
}
 0x363   : > { %s4436_s10 = scalar_lea.hbm %s5578_s2, 2048  ;;  %s4440_s30 = scalar_lea.hbm %s5667_s13, 4096 }
 0x364   : > { %p4437_p13 = scmp.ne.s32.totalorder %s5578_s2, %s4436_s10  ;;  %p4441_p10 = scmp.lt.s32.totalorder %s5578_s2, %s5667_s13 }
 0x365   : > { %p4442_p11 = scmp.lt.s32.totalorder %s4440_s30, %s4436_s10 }
 0x366   : > { %p4438_p0 = pnand %p4437_p13, %p4662_p3 }
 0x367   : > { %p4443_p1 = por %p4442_p11, %p4441_p10 }
 0x368   : > { %p4439_p5 = pneg %p4438_p0 }
 0x36a   : > { %p4444_p4 = pnand %p4443_p1, %p4439_p5 }
 0x36c   : > { %4447 = shalt.err (!%p4444_p4)
}
 0x36d   : > { %s4523_s8 = smov 64   ;;  %s4524_s18 = smov 4  }
 0x36e   : > { %4110 = dma.vmem_to_hbm [thread:$0]  (%p4662_p3), %s5580_s23, 2048, %s5578_s2, %s3024_s27, %s4523_s8, %s4523_s8, %s4524_s18  }
 0x36f PF: > { %s5668_s19 = sld [smem:[#allocation16_spill]]  ;;  %p5670_p8 = scmp.ge.s32.totalorder %s4514_s29, 2 }
 0x371   : > { %p4127_p7 = pnand %p5670_p8, %p4610_p6 }
 0x373   : > { %p4128_p2 = pneg %p4127_p7 }
 0x375   : > { %s3055_s22 = sand.u32 1, %s5668_s19  }
 0x376   : > { %s3056_s12 = scalar_lea.sflag [#allocation4], %s3055_s22 }
 0x377   : > { %4489 = dma.done.wait (%p4128_p2), %s3056_s12, 2048  }
 0x378   : > { %4491 = vsyncadd (%p4128_p2), %s3056_s12, 4294965248  ;;  %s27_s29 = sadd.s32 1, %s4514_s29   ;;  %s5671_s21 = sld [smem:[#allocation17_spill]] }
 0x379   : > { %p24_p9 = scmp.ge.s32.totalorder %s27_s29, 4   ;;  %s5672_s26 = sld [smem:[#allocation20_spill]] }
 0x37a   : > { %s5673_s14 = sld [smem:[#allocation19_spill]]  ;;  %s5674_s24 = smov %s4498_s25 }
 0x37b   : > { %s5676_s27 = smov %s4510_s28 }
 0x37c   :  { %26 = sbr.rel (!%p24_p9) target bundleno = 14 (0xe), region = 116 }
 0x37e   : > { %s5675_s25 = smov %s5671_s21 }
 0x380   : > { %s5677_s28 = smov %s5673_s14 }
 0x381   :  { %3061 = vsyncpa [#allocation3], 1 }
 0x382   :  { %3063 = vsyncpa [#allocation3 + $0x1], 1 }
 0x383   :  { %3064 = vsyncpa [#allocation6], 1 }
 0x384   :  { %3066 = vsyncpa [#allocation6 + $0x1], 1 }
 0x385   :  { %3067 = vsyncpa [#allocation9], 1 }
 0x386   :  { %3068 = vsyncpa [#allocation4], 1 }
 0x387   :  { %3070 = vsyncpa [#allocation4 + $0x1], 1 }

</bundles_post_ra>
